<compile_context>
chip_gen: v7x
topology: tpu7x:2x2x1
jax: 0.10.0
libtpu: 0.0.40
codegen_flags: <defaults>
</compile_context>

<pallas_src>
import math
from functools import partial

import jax
import jax.numpy as jnp
from jax.experimental import pallas as pl
from jax.experimental.pallas import tpu as pltpu

# ----------------------------- small "Electra" config -----------------------
VOCAB = 100
EXTRA_TOKENS = 20            # resize_token_embeddings(vocab + 20)
VOCAB_FULL = VOCAB + EXTRA_TOKENS
HIDDEN = 32
N_LAYERS = 2
N_HEADS = 4
HEAD_DIM = HIDDEN // N_HEADS
FFN = 64
MAX_POS = 16
HEAD_HIDDEN = 128            # Linear(hidden_size, 128) in the keyword head
LN_EPS = 1e-12               # Electra backbone LayerNorm eps
HEAD_LN_EPS = 1e-5           # nn.LayerNorm default eps


# ----------------------------- in-kernel helpers -----------------------------
def _gelu(x):
    # TODO(synk): tanh approximation of GELU; HF Electra "gelu" is the exact
    # erf-based GELU, so logits differ slightly from the PyTorch reference.
    c = 0.7978845608028654  # sqrt(2/pi)
    return 0.5 * x * (1.0 + jnp.tanh(c * (x + 0.044715 * x * x * x)))


def _layernorm(x, gamma, beta, eps):
    mean = jnp.mean(x, axis=-1, keepdims=True)
    var = jnp.mean((x - mean) ** 2, axis=-1, keepdims=True)
    return (x - mean) * jax.lax.rsqrt(var + eps) * gamma + beta


# ----------------------------- fully fused forward + loss kernel -------------
def _fused_kernel(B, S,
                  ids_ref, bidc_ref, bidr_ref, mask_ref, labels_ref,
                  wemb_ref, pte_ref, eg_ref, eb_ref,
                  wqkv_ref, bqkv_ref, wo_ref, bo_ref, ln1g_ref, ln1b_ref,
                  w1_ref, b1_ref, w2_ref, b2_ref, ln2g_ref, ln2b_ref,
                  hw1_ref, hb1_ref, hlng_ref, hlnb_ref, hw2_ref, hb2_ref,
                  logits_ref, loss_ref):
    BS = B * S

    # ---- embedding lookup fused in-kernel (one-hot matmul; no XLA gather,
    #      no (B,S,H) HBM round trip) ----
    ids = ids_ref[...]                                               # (BS, 1) i32
    vocab_iota = jax.lax.broadcasted_iota(jnp.int32, (BS, VOCAB_FULL), 1)
    onehot = (ids == vocab_iota).astype(jnp.float32)                 # (BS, V)
    emb = jnp.dot(onehot, wemb_ref[...], preferred_element_type=jnp.float32)
    pos_type = pte_ref[0:S, :]                                       # (S, H)
    emb = emb + jnp.concatenate([pos_type] * B, axis=0)              # (BS, H)
    x = _layernorm(emb, eg_ref[...], eb_ref[...], LN_EPS)

    # ---- block-diagonal additive attention bias, built in-register ----
    same = bidc_ref[...] == bidr_ref[...]                            # (BS, BS)
    key_ok = mask_ref[...] > 0.5                                     # (1, BS)
    bias = jnp.where(jnp.logical_and(same, key_ok), 0.0, -1e9)       # (BS, BS)

    for l in range(N_LAYERS):
        # ---- fused QKV projection (scale already folded into Wq) ----
        qkv = jnp.dot(x, wqkv_ref[l],
                      preferred_element_type=jnp.float32) + bqkv_ref[l]   # (BS, 3H)
        wo_l = wo_ref[l]                                                  # (H, H)
        attn = jnp.zeros((BS, HIDDEN), jnp.float32) + bo_ref[l]

        for h in range(N_HEADS):
            lo = h * HEAD_DIM
            qh = qkv[:, lo:lo + HEAD_DIM]                                 # (BS, dH)
            kh = qkv[:, HIDDEN + lo:HIDDEN + lo + HEAD_DIM]
            vh = qkv[:, 2 * HIDDEN + lo:2 * HIDDEN + lo + HEAD_DIM]

            s = jax.lax.dot_general(qh, kh, (((1,), (1,)), ((), ())),
                                    preferred_element_type=jnp.float32)   # (BS, BS)
            s = s + bias
            m = jnp.max(s, axis=-1, keepdims=True)
            p = jnp.exp(s - m)
            p = p * pl.reciprocal(jnp.sum(p, axis=-1, keepdims=True),
                                  approx=True)
            ctx = jnp.dot(p, vh, preferred_element_type=jnp.float32)      # (BS, dH)
            # fold head context straight into the output projection (no concat)
            attn = attn + jnp.dot(ctx, wo_l[lo:lo + HEAD_DIM, :],
                                  preferred_element_type=jnp.float32)

        x = _layernorm(attn + x, ln1g_ref[l], ln1b_ref[l], LN_EPS)

        # ---- FFN (GELU) + add & LN ----
        hmid = _gelu(jnp.dot(x, w1_ref[l],
                             preferred_element_type=jnp.float32) + b1_ref[l])
        ffn = jnp.dot(hmid, w2_ref[l],
                      preferred_element_type=jnp.float32) + b2_ref[l]
        x = _layernorm(ffn + x, ln2g_ref[l], ln2b_ref[l], LN_EPS)

    # ---- keyword head: Dropout(id) -> Linear(H,128) -> ReLU -> LN ->
    #      Dropout(id) -> Linear(128,1) in row form (lane-dense store) ----
    hh = jnp.dot(x, hw1_ref[...],
                 preferred_element_type=jnp.float32) + hb1_ref[...]       # (BS, 128)
    hh = jnp.maximum(hh, 0.0)
    hh = _layernorm(hh, hlng_ref[...], hlnb_ref[...], HEAD_LN_EPS)
    logits = jax.lax.dot_general(hw2_ref[...], hh, (((1,), (1,)), ((), ())),
                                 preferred_element_type=jnp.float32) + hb2_ref[...]
    logits_ref[...] = logits                                              # (1, BS)

    # ---- fused masked BCE-with-logits loss (numerically stable) ----
    y = labels_ref[...]
    m = mask_ref[...]
    per = (jnp.maximum(logits, 0.0) - logits * y
           + jnp.log(1.0 + jnp.exp(-jnp.abs(logits))))
    total = jnp.sum(per * m)
    # TODO(synk): PyTorch BCEWithLogitsLoss over an empty selection gives NaN;
    # here an all-masked batch yields loss 0 instead.
    count = jnp.maximum(jnp.sum(m), 1.0)
    loss_ref[0, 0] = total / count


def _full_spec(arr):
    """Whole-array block (single grid step -> everything resident in VMEM)."""
    nd = arr.ndim
    return pl.BlockSpec(arr.shape, lambda i, _z=(0,) * nd: _z)


def fused_forward_and_loss(params, input_ids, attention_mask, labels):
    """Returns (logits (B,S) f32, masked BCE loss scalar) from one pallas_call."""
    B, S = input_ids.shape
    BS = B * S

    ids_col = input_ids.astype(jnp.int32).reshape(BS, 1)
    bid = jnp.repeat(jnp.arange(B, dtype=jnp.int32), S)   # shape-only; XLA constant-folds
    bid_col = bid.reshape(BS, 1)
    bid_row = bid.reshape(1, BS)
    mask_row = attention_mask.astype(jnp.float32).reshape(1, BS)
    labels_row = labels.astype(jnp.float32).reshape(1, BS)

    weight_args = (
        params["word_emb"], params["pos_type_emb"],
        params["emb_ln_g"], params["emb_ln_b"],
        params["wqkv"], params["bqkv"], params["wo"], params["bo"],
        params["ln1_g"], params["ln1_b"],
        params["w1"], params["b1"], params["w2"], params["b2"],
        params["ln2_g"], params["ln2_b"],
        params["head_w1"], params["head_b1"],
        params["head_ln_g"], params["head_ln_b"],
        params["head_w2"], params["head_b2"],
    )
    operands = (ids_col, bid_col, bid_row, mask_row, labels_row) + weight_args
    in_specs = [_full_spec(a) for a in operands]

    # advisory cost hint so XLA does not over-serialize around the custom call
    flops = int(
        2 * BS * VOCAB_FULL * HIDDEN
        + N_LAYERS * (2 * BS * HIDDEN * 3 * HIDDEN
                      + N_HEADS * (4 * BS * BS * HEAD_DIM + 2 * BS * HEAD_DIM * HIDDEN)
                      + 4 * BS * HIDDEN * FFN)
        + 2 * BS * HIDDEN * HEAD_HIDDEN + 2 * BS * HEAD_HIDDEN)
    transcendentals = int(N_LAYERS * (N_HEADS * BS * BS + BS * FFN) + BS)
    bytes_accessed = int(sum(a.size * a.dtype.itemsize for a in operands)
                         + BS * 4 + 4)

    logits_row, loss = pl.pallas_call(
        partial(_fused_kernel, B, S),
        out_shape=(jax.ShapeDtypeStruct((1, BS), jnp.float32),
                   jax.ShapeDtypeStruct((1, 1), jnp.float32)),
        grid=(1,),
        in_specs=in_specs,
        out_specs=(pl.BlockSpec((1, BS), lambda i: (0, 0)),
                   pl.BlockSpec(memory_space=pltpu.MemorySpace.SMEM)),
        compiler_params=pltpu.CompilerParams(
            dimension_semantics=("arbitrary",)),
        cost_estimate=pl.CostEstimate(flops=flops,
                                      transcendentals=transcendentals,
                                      bytes_accessed=bytes_accessed),
    )(*operands)
    return logits_row.reshape(B, S), loss[0, 0]


# ----------------------------- parameters ------------------------------------
def init_params(key):
    k = iter(jax.random.split(key, 64))
    init = lambda kk, shape: (0.02 * jax.random.normal(kk, shape)).astype(jnp.float32)
    scale = 1.0 / math.sqrt(HEAD_DIM)

    word_emb = init(next(k), (VOCAB_FULL, HIDDEN))
    pos_emb = init(next(k), (MAX_POS, HIDDEN))
    type_emb = init(next(k), (2, HIDDEN))

    params = {
        "word_emb": word_emb,
        # position + token-type(0) embeddings folded into one resident table
        "pos_type_emb": (pos_emb + type_emb[0][None, :]).astype(jnp.float32),
        "emb_ln_g": jnp.ones((1, HIDDEN), jnp.float32),
        "emb_ln_b": jnp.zeros((1, HIDDEN), jnp.float32),
    }

    wqkv, bqkv, wo, bo = [], [], [], []
    ln1g, ln1b, w1, b1, w2, b2, ln2g, ln2b = [], [], [], [], [], [], [], []
    for _ in range(N_LAYERS):
        # fold the 1/sqrt(head_dim) attention scale into the Q projection
        wq = init(next(k), (HIDDEN, HIDDEN)) * scale
        wk = init(next(k), (HIDDEN, HIDDEN))
        wv = init(next(k), (HIDDEN, HIDDEN))
        wqkv.append(jnp.concatenate([wq, wk, wv], axis=1))
        bqkv.append(jnp.zeros((1, 3 * HIDDEN), jnp.float32))
        wo.append(init(next(k), (HIDDEN, HIDDEN)))
        bo.append(jnp.zeros((1, HIDDEN), jnp.float32))
        ln1g.append(jnp.ones((1, HIDDEN), jnp.float32))
        ln1b.append(jnp.zeros((1, HIDDEN), jnp.float32))
        w1.append(init(next(k), (HIDDEN, FFN)))
        b1.append(jnp.zeros((1, FFN), jnp.float32))
        w2.append(init(next(k), (FFN, HIDDEN)))
        b2.append(jnp.zeros((1, HIDDEN), jnp.float32))
        ln2g.append(jnp.ones((1, HIDDEN), jnp.float32))
        ln2b.append(jnp.zeros((1, HIDDEN), jnp.float32))

    params.update(
        wqkv=jnp.stack(wqkv), bqkv=jnp.stack(bqkv),
        wo=jnp.stack(wo), bo=jnp.stack(bo),
        ln1_g=jnp.stack(ln1g), ln1_b=jnp.stack(ln1b),
        w1=jnp.stack(w1), b1=jnp.stack(b1),
        w2=jnp.stack(w2), b2=jnp.stack(b2),
        ln2_g=jnp.stack(ln2g), ln2_b=jnp.stack(ln2b),
    )

    params["head_w1"] = init(next(k), (HIDDEN, HEAD_HIDDEN))
    params["head_b1"] = jnp.zeros((1, HEAD_HIDDEN), jnp.float32)
    params["head_ln_g"] = jnp.ones((1, HEAD_HIDDEN), jnp.float32)
    params["head_ln_b"] = jnp.zeros((1, HEAD_HIDDEN), jnp.float32)
    params["head_w2"] = init(next(k), (1, HEAD_HIDDEN))   # row form: lane-dense logits
    params["head_b2"] = jnp.zeros((1, 1), jnp.float32)
    return params


# ----------------------------- model glue (plain JAX) ------------------------
@jax.jit
def forward_eval(params, input_ids, attention_mask):
    logits, _ = fused_forward_and_loss(
        params, input_ids, attention_mask,
        jnp.zeros(input_ids.shape, jnp.float32))    # dummy labels, loss ignored
    # TODO(synk): descending sort + gather have no clean Pallas TPU primitive;
    # done in plain JAX (matches torch.sort(-1, True) + gather; tie ordering of
    # equal logits may differ since argsort is stable and torch.sort is not).
    order = jnp.argsort(-logits, axis=-1)
    return jnp.take_along_axis(input_ids, order, axis=-1)


@jax.jit
def forward_train(params, input_ids, attention_mask, labels):
    # TODO(synk): Dropout(0.1) in training mode treated as identity (no RNG state here).
    _, loss = fused_forward_and_loss(params, input_ids, attention_mask, labels)
    return loss


# ----------------------------- main ------------------------------------------
if __name__ == "__main__":
    key = jax.random.PRNGKey(0)
    k_param, k_ids, k_lbl = jax.random.split(key, 3)

    B, S = 2, 8
    params = init_params(k_param)

    input_ids = jax.random.randint(k_ids, (B, S), 0, VOCAB_FULL, dtype=jnp.int32)
    attention_mask = jnp.array([[1, 1, 1, 1, 1, 1, 1, 1],
                                [1, 1, 1, 1, 1, 1, 0, 0]], dtype=jnp.int32)
    labels = jax.random.bernoulli(k_lbl, 0.3, (B, S)).astype(jnp.float32)

    sorted_ids = forward_eval(params, input_ids, attention_mask)
    loss = forward_train(params, input_ids, attention_mask, labels)

    jax.block_until_ready((sorted_ids, loss))
    assert sorted_ids.shape == (B, S)
    assert loss.shape == ()
    assert bool(jnp.isfinite(loss))
    print("KERNEL_OK")
</pallas_src>

<mosaic_0001>
module attributes {stable_mosaic.version = 11 : i64} {
  func.func @_fused_kernel(%arg0: i32, %arg1: memref<16x1xi32, #tpu.memory_space<vmem>>, %arg2: memref<16x1xi32, #tpu.memory_space<vmem>>, %arg3: memref<1x16xi32, #tpu.memory_space<vmem>>, %arg4: memref<1x16xf32, #tpu.memory_space<vmem>>, %arg5: memref<1x16xf32, #tpu.memory_space<vmem>>, %arg6: memref<120x32xf32, #tpu.memory_space<vmem>>, %arg7: memref<16x32xf32, #tpu.memory_space<vmem>>, %arg8: memref<1x32xf32, #tpu.memory_space<vmem>>, %arg9: memref<1x32xf32, #tpu.memory_space<vmem>>, %arg10: memref<2x32x96xf32, #tpu.memory_space<vmem>>, %arg11: memref<2x1x96xf32, #tpu.memory_space<vmem>>, %arg12: memref<2x32x32xf32, #tpu.memory_space<vmem>>, %arg13: memref<2x1x32xf32, #tpu.memory_space<vmem>>, %arg14: memref<2x1x32xf32, #tpu.memory_space<vmem>>, %arg15: memref<2x1x32xf32, #tpu.memory_space<vmem>>, %arg16: memref<2x32x64xf32, #tpu.memory_space<vmem>>, %arg17: memref<2x1x64xf32, #tpu.memory_space<vmem>>, %arg18: memref<2x64x32xf32, #tpu.memory_space<vmem>>, %arg19: memref<2x1x32xf32, #tpu.memory_space<vmem>>, %arg20: memref<2x1x32xf32, #tpu.memory_space<vmem>>, %arg21: memref<2x1x32xf32, #tpu.memory_space<vmem>>, %arg22: memref<32x128xf32, #tpu.memory_space<vmem>>, %arg23: memref<1x128xf32, #tpu.memory_space<vmem>>, %arg24: memref<1x128xf32, #tpu.memory_space<vmem>>, %arg25: memref<1x128xf32, #tpu.memory_space<vmem>>, %arg26: memref<1x128xf32, #tpu.memory_space<vmem>>, %arg27: memref<1x1xf32, #tpu.memory_space<vmem>>, %arg28: memref<1x16xf32, #tpu.memory_space<vmem>>, %arg29: memref<1x1xf32, #tpu.memory_space<smem>>) attributes {dimension_semantics = [#tpu.dimension_semantics<arbitrary>], iteration_bounds = array<i64: 1>, scalar_prefetch = 0 : i64, scratch_operands = 0 : i64, tpu.core_type = #tpu.core_type<tc>, window_params = [{pipeline_mode = #tpu.pipeline_mode<synchronous>, transform_indices = @transform_0, window_bounds = array<i64: 16, 1>}, {pipeline_mode = #tpu.pipeline_mode<synchronous>, transform_indices = @transform_1, window_bounds = array<i64: 16, 1>}, {pipeline_mode = #tpu.pipeline_mode<synchronous>, transform_indices = @transform_2, window_bounds = array<i64: 1, 16>}, {pipeline_mode = #tpu.pipeline_mode<synchronous>, transform_indices = @transform_3, window_bounds = array<i64: 1, 16>}, {pipeline_mode = #tpu.pipeline_mode<synchronous>, transform_indices = @transform_4, window_bounds = array<i64: 1, 16>}, {pipeline_mode = #tpu.pipeline_mode<synchronous>, transform_indices = @transform_5, window_bounds = array<i64: 120, 32>}, {pipeline_mode = #tpu.pipeline_mode<synchronous>, transform_indices = @transform_6, window_bounds = array<i64: 16, 32>}, {pipeline_mode = #tpu.pipeline_mode<synchronous>, transform_indices = @transform_7, window_bounds = array<i64: 1, 32>}, {pipeline_mode = #tpu.pipeline_mode<synchronous>, transform_indices = @transform_8, window_bounds = array<i64: 1, 32>}, {pipeline_mode = #tpu.pipeline_mode<synchronous>, transform_indices = @transform_9, window_bounds = array<i64: 2, 32, 96>}, {pipeline_mode = #tpu.pipeline_mode<synchronous>, transform_indices = @transform_10, window_bounds = array<i64: 2, 1, 96>}, {pipeline_mode = #tpu.pipeline_mode<synchronous>, transform_indices = @transform_11, window_bounds = array<i64: 2, 32, 32>}, {pipeline_mode = #tpu.pipeline_mode<synchronous>, transform_indices = @transform_12, window_bounds = array<i64: 2, 1, 32>}, {pipeline_mode = #tpu.pipeline_mode<synchronous>, transform_indices = @transform_13, window_bounds = array<i64: 2, 1, 32>}, {pipeline_mode = #tpu.pipeline_mode<synchronous>, transform_indices = @transform_14, window_bounds = array<i64: 2, 1, 32>}, {pipeline_mode = #tpu.pipeline_mode<synchronous>, transform_indices = @transform_15, window_bounds = array<i64: 2, 32, 64>}, {pipeline_mode = #tpu.pipeline_mode<synchronous>, transform_indices = @transform_16, window_bounds = array<i64: 2, 1, 64>}, {pipeline_mode = #tpu.pipeline_mode<synchronous>, transform_indices = @transform_17, window_bounds = array<i64: 2, 64, 32>}, {pipeline_mode = #tpu.pipeline_mode<synchronous>, transform_indices = @transform_18, window_bounds = array<i64: 2, 1, 32>}, {pipeline_mode = #tpu.pipeline_mode<synchronous>, transform_indices = @transform_19, window_bounds = array<i64: 2, 1, 32>}, {pipeline_mode = #tpu.pipeline_mode<synchronous>, transform_indices = @transform_20, window_bounds = array<i64: 2, 1, 32>}, {pipeline_mode = #tpu.pipeline_mode<synchronous>, transform_indices = @transform_21, window_bounds = array<i64: 32, 128>}, {pipeline_mode = #tpu.pipeline_mode<synchronous>, transform_indices = @transform_22, window_bounds = array<i64: 1, 128>}, {pipeline_mode = #tpu.pipeline_mode<synchronous>, transform_indices = @transform_23, window_bounds = array<i64: 1, 128>}, {pipeline_mode = #tpu.pipeline_mode<synchronous>, transform_indices = @transform_24, window_bounds = array<i64: 1, 128>}, {pipeline_mode = #tpu.pipeline_mode<synchronous>, transform_indices = @transform_25, window_bounds = array<i64: 1, 128>}, {pipeline_mode = #tpu.pipeline_mode<synchronous>, transform_indices = @transform_26, window_bounds = array<i64: 1, 1>}, {pipeline_mode = #tpu.pipeline_mode<synchronous>, transform_indices = @transform_27, window_bounds = array<i64: 1, 16>}, {transform_indices = @transform_28, window_bounds = array<i64: 1, 1>}]} {
    %c0 = arith.constant 0 : index
    %c0_0 = arith.constant 0 : index
    %0 = vector.load %arg1[%c0, %c0_0] : memref<16x1xi32, #tpu.memory_space<vmem>>, vector<16x1xi32>
    %1 = tpu.iota {dimensions = array<i32: 1>} : vector<16x120xi32>
    %2 = vector.broadcast %0 : vector<16x1xi32> to vector<16x120xi32>
    %3 = arith.cmpi eq, %2, %1 : vector<16x120xi32>
    %4 = arith.extui %3 : vector<16x120xi1> to vector<16x120xi32>
    %5 = arith.sitofp %4 : vector<16x120xi32> to vector<16x120xf32>
    %c0_1 = arith.constant 0 : index
    %c0_2 = arith.constant 0 : index
    %6 = vector.load %arg6[%c0_1, %c0_2] : memref<120x32xf32, #tpu.memory_space<vmem>>, vector<120x32xf32>
    %cst = arith.constant dense<0.000000e+00> : vector<16x32xf32>
    %7 = tpu.matmul %5, %6, %cst {dimension_numbers = #tpu.dot_dimension_numbers<[1], [0], [0], [1], [0, 0, 1, 1], [], []>} : vector<16x120xf32>, vector<120x32xf32>, vector<16x32xf32> -> vector<16x32xf32>
    %c0_3 = arith.constant 0 : index
    %c0_4 = arith.constant 0 : index
    %8 = vector.load %arg7[%c0_3, %c0_4] : memref<16x32xf32, #tpu.memory_space<vmem>>, vector<8x32xf32>
    %9 = tpu.concatenate %8, %8 in 0 : vector<8x32xf32>, vector<8x32xf32> -> vector<16x32xf32>
    %10 = arith.addf %7, %9 : vector<16x32xf32>
    %c0_5 = arith.constant 0 : index
    %c0_6 = arith.constant 0 : index
    %11 = vector.load %arg8[%c0_5, %c0_6] : memref<1x32xf32, #tpu.memory_space<vmem>>, vector<1x32xf32>
    %c0_7 = arith.constant 0 : index
    %c0_8 = arith.constant 0 : index
    %12 = vector.load %arg9[%c0_7, %c0_8] : memref<1x32xf32, #tpu.memory_space<vmem>>, vector<1x32xf32>
    %cst_9 = arith.constant dense<0.000000e+00> : vector<16xf32>
    %13 = vector.multi_reduction <add>, %10, %cst_9 [1] : vector<16x32xf32> to vector<16xf32>
    %14 = vector.shape_cast %13 : vector<16xf32> to vector<16x1xf32>
    %cst_10 = arith.constant 3.200000e+01 : f32
    %15 = vector.broadcast %cst_10 : f32 to vector<16x1xf32>
    %16 = arith.divf %14, %15 : vector<16x1xf32>
    %17 = vector.broadcast %16 : vector<16x1xf32> to vector<16x32xf32>
    %18 = arith.subf %10, %17 : vector<16x32xf32>
    %19 = arith.mulf %18, %18 : vector<16x32xf32>
    %cst_11 = arith.constant dense<0.000000e+00> : vector<16xf32>
    %20 = vector.multi_reduction <add>, %19, %cst_11 [1] : vector<16x32xf32> to vector<16xf32>
    %21 = vector.shape_cast %20 : vector<16xf32> to vector<16x1xf32>
    %cst_12 = arith.constant 3.200000e+01 : f32
    %22 = vector.broadcast %cst_12 : f32 to vector<16x1xf32>
    %23 = arith.divf %21, %22 : vector<16x1xf32>
    %24 = vector.broadcast %16 : vector<16x1xf32> to vector<16x32xf32>
    %25 = arith.subf %10, %24 : vector<16x32xf32>
    %cst_13 = arith.constant 9.99999996E-13 : f32
    %26 = vector.broadcast %cst_13 : f32 to vector<16x1xf32>
    %27 = arith.addf %23, %26 : vector<16x1xf32>
    %28 = math.rsqrt %27 : vector<16x1xf32>
    %29 = vector.broadcast %28 : vector<16x1xf32> to vector<16x32xf32>
    %30 = arith.mulf %25, %29 : vector<16x32xf32>
    %31 = vector.broadcast %11 : vector<1x32xf32> to vector<16x32xf32>
    %32 = arith.mulf %30, %31 : vector<16x32xf32>
    %33 = vector.broadcast %12 : vector<1x32xf32> to vector<16x32xf32>
    %34 = arith.addf %32, %33 : vector<16x32xf32>
    %c0_14 = arith.constant 0 : index
    %c0_15 = arith.constant 0 : index
    %35 = vector.load %arg2[%c0_14, %c0_15] : memref<16x1xi32, #tpu.memory_space<vmem>>, vector<16x1xi32>
    %c0_16 = arith.constant 0 : index
    %c0_17 = arith.constant 0 : index
    %36 = vector.load %arg3[%c0_16, %c0_17] : memref<1x16xi32, #tpu.memory_space<vmem>>, vector<1x16xi32>
    %37 = vector.broadcast %35 : vector<16x1xi32> to vector<16x16xi32>
    %38 = vector.broadcast %36 : vector<1x16xi32> to vector<16x16xi32>
    %39 = arith.cmpi eq, %37, %38 : vector<16x16xi32>
    %c0_18 = arith.constant 0 : index
    %c0_19 = arith.constant 0 : index
    %40 = vector.load %arg4[%c0_18, %c0_19] : memref<1x16xf32, #tpu.memory_space<vmem>>, vector<1x16xf32>
    %cst_20 = arith.constant 5.000000e-01 : f32
    %41 = vector.broadcast %cst_20 : f32 to vector<1x16xf32>
    %42 = arith.cmpf ogt, %40, %41 : vector<1x16xf32>
    %43 = vector.broadcast %42 : vector<1x16xi1> to vector<16x16xi1>
    %44 = arith.andi %39, %43 : vector<16x16xi1>
    %cst_21 = arith.constant 0.000000e+00 : f32
    %cst_22 = arith.constant -1.000000e+09 : f32
    %45 = vector.broadcast %cst_21 : f32 to vector<16x16xf32>
    %46 = vector.broadcast %cst_22 : f32 to vector<16x16xf32>
    %47 = arith.select %44, %45, %46 : vector<16x16xi1>, vector<16x16xf32>
    %c0_23 = arith.constant 0 : index
    %c0_24 = arith.constant 0 : index
    %c0_25 = arith.constant 0 : index
    %48 = vector.load %arg10[%c0_23, %c0_24, %c0_25] : memref<2x32x96xf32, #tpu.memory_space<vmem>>, vector<1x32x96xf32>
    %49 = vector.shape_cast %48 : vector<1x32x96xf32> to vector<32x96xf32>
    %cst_26 = arith.constant dense<0.000000e+00> : vector<16x96xf32>
    %50 = tpu.matmul %34, %49, %cst_26 {dimension_numbers = #tpu.dot_dimension_numbers<[1], [0], [0], [1], [0, 0, 1, 1], [], []>} : vector<16x32xf32>, vector<32x96xf32>, vector<16x96xf32> -> vector<16x96xf32>
    %c0_27 = arith.constant 0 : index
    %c0_28 = arith.constant 0 : index
    %c0_29 = arith.constant 0 : index
    %51 = vector.load %arg11[%c0_27, %c0_28, %c0_29] : memref<2x1x96xf32, #tpu.memory_space<vmem>>, vector<1x1x96xf32>
    %52 = vector.shape_cast %51 : vector<1x1x96xf32> to vector<1x96xf32>
    %53 = vector.broadcast %52 : vector<1x96xf32> to vector<16x96xf32>
    %54 = arith.addf %50, %53 : vector<16x96xf32>
    %c0_30 = arith.constant 0 : index
    %c0_31 = arith.constant 0 : index
    %c0_32 = arith.constant 0 : index
    %55 = vector.load %arg12[%c0_30, %c0_31, %c0_32] : memref<2x32x32xf32, #tpu.memory_space<vmem>>, vector<1x32x32xf32>
    %56 = vector.shape_cast %55 : vector<1x32x32xf32> to vector<32x32xf32>
    %cst_33 = arith.constant 0.000000e+00 : f32
    %57 = vector.broadcast %cst_33 : f32 to vector<16x32xf32>
    %c0_34 = arith.constant 0 : index
    %c0_35 = arith.constant 0 : index
    %c0_36 = arith.constant 0 : index
    %58 = vector.load %arg13[%c0_34, %c0_35, %c0_36] : memref<2x1x32xf32, #tpu.memory_space<vmem>>, vector<1x1x32xf32>
    %59 = vector.shape_cast %58 : vector<1x1x32xf32> to vector<1x32xf32>
    %60 = vector.broadcast %59 : vector<1x32xf32> to vector<16x32xf32>
    %61 = arith.addf %57, %60 : vector<16x32xf32>
    %62 = vector.extract_strided_slice %54 {offsets = [0, 0], sizes = [16, 8], strides = [1, 1]} : vector<16x96xf32> to vector<16x8xf32>
    %63 = vector.extract_strided_slice %54 {offsets = [0, 32], sizes = [16, 8], strides = [1, 1]} : vector<16x96xf32> to vector<16x8xf32>
    %64 = vector.extract_strided_slice %54 {offsets = [0, 64], sizes = [16, 8], strides = [1, 1]} : vector<16x96xf32> to vector<16x8xf32>
    %cst_37 = arith.constant dense<0.000000e+00> : vector<16x16xf32>
    %65 = tpu.matmul %62, %63, %cst_37 {dimension_numbers = #tpu.dot_dimension_numbers<[1], [1], [0], [0], [0, 0, 1, 0], [], []>} : vector<16x8xf32>, vector<16x8xf32>, vector<16x16xf32> -> vector<16x16xf32>
    %66 = arith.addf %65, %47 : vector<16x16xf32>
    %cst_38 = arith.constant dense<0xFF800000> : vector<16xf32>
    %67 = vector.multi_reduction <maximumf>, %66, %cst_38 [1] : vector<16x16xf32> to vector<16xf32>
    %68 = vector.shape_cast %67 : vector<16xf32> to vector<16x1xf32>
    %69 = vector.broadcast %68 : vector<16x1xf32> to vector<16x16xf32>
    %70 = arith.subf %66, %69 : vector<16x16xf32>
    %71 = math.exp %70 : vector<16x16xf32>
    %cst_39 = arith.constant dense<0.000000e+00> : vector<16xf32>
    %72 = vector.multi_reduction <add>, %71, %cst_39 [1] : vector<16x16xf32> to vector<16xf32>
    %73 = vector.shape_cast %72 : vector<16xf32> to vector<16x1xf32>
    %74 = tpu.reciprocal %73 {approx = true} : vector<16x1xf32> -> vector<16x1xf32>
    %75 = vector.broadcast %74 : vector<16x1xf32> to vector<16x16xf32>
    %76 = arith.mulf %71, %75 : vector<16x16xf32>
    %cst_40 = arith.constant dense<0.000000e+00> : vector<16x8xf32>
    %77 = tpu.matmul %76, %64, %cst_40 {dimension_numbers = #tpu.dot_dimension_numbers<[1], [0], [0], [1], [0, 0, 1, 1], [], []>} : vector<16x16xf32>, vector<16x8xf32>, vector<16x8xf32> -> vector<16x8xf32>
    %78 = vector.extract_strided_slice %56 {offsets = [0, 0], sizes = [8, 32], strides = [1, 1]} : vector<32x32xf32> to vector<8x32xf32>
    %cst_41 = arith.constant dense<0.000000e+00> : vector<16x32xf32>
    %79 = tpu.matmul %77, %78, %cst_41 {dimension_numbers = #tpu.dot_dimension_numbers<[1], [0], [0], [1], [0, 0, 1, 1], [], []>} : vector<16x8xf32>, vector<8x32xf32>, vector<16x32xf32> -> vector<16x32xf32>
    %80 = arith.addf %61, %79 : vector<16x32xf32>
    %81 = vector.extract_strided_slice %54 {offsets = [0, 8], sizes = [16, 8], strides = [1, 1]} : vector<16x96xf32> to vector<16x8xf32>
    %82 = vector.extract_strided_slice %54 {offsets = [0, 40], sizes = [16, 8], strides = [1, 1]} : vector<16x96xf32> to vector<16x8xf32>
    %83 = vector.extract_strided_slice %54 {offsets = [0, 72], sizes = [16, 8], strides = [1, 1]} : vector<16x96xf32> to vector<16x8xf32>
    %cst_42 = arith.constant dense<0.000000e+00> : vector<16x16xf32>
    %84 = tpu.matmul %81, %82, %cst_42 {dimension_numbers = #tpu.dot_dimension_numbers<[1], [1], [0], [0], [0, 0, 1, 0], [], []>} : vector<16x8xf32>, vector<16x8xf32>, vector<16x16xf32> -> vector<16x16xf32>
    %85 = arith.addf %84, %47 : vector<16x16xf32>
    %cst_43 = arith.constant dense<0xFF800000> : vector<16xf32>
    %86 = vector.multi_reduction <maximumf>, %85, %cst_43 [1] : vector<16x16xf32> to vector<16xf32>
    %87 = vector.shape_cast %86 : vector<16xf32> to vector<16x1xf32>
    %88 = vector.broadcast %87 : vector<16x1xf32> to vector<16x16xf32>
    %89 = arith.subf %85, %88 : vector<16x16xf32>
    %90 = math.exp %89 : vector<16x16xf32>
    %cst_44 = arith.constant dense<0.000000e+00> : vector<16xf32>
    %91 = vector.multi_reduction <add>, %90, %cst_44 [1] : vector<16x16xf32> to vector<16xf32>
    %92 = vector.shape_cast %91 : vector<16xf32> to vector<16x1xf32>
    %93 = tpu.reciprocal %92 {approx = true} : vector<16x1xf32> -> vector<16x1xf32>
    %94 = vector.broadcast %93 : vector<16x1xf32> to vector<16x16xf32>
    %95 = arith.mulf %90, %94 : vector<16x16xf32>
    %cst_45 = arith.constant dense<0.000000e+00> : vector<16x8xf32>
    %96 = tpu.matmul %95, %83, %cst_45 {dimension_numbers = #tpu.dot_dimension_numbers<[1], [0], [0], [1], [0, 0, 1, 1], [], []>} : vector<16x16xf32>, vector<16x8xf32>, vector<16x8xf32> -> vector<16x8xf32>
    %97 = vector.extract_strided_slice %56 {offsets = [8, 0], sizes = [8, 32], strides = [1, 1]} : vector<32x32xf32> to vector<8x32xf32>
    %cst_46 = arith.constant dense<0.000000e+00> : vector<16x32xf32>
    %98 = tpu.matmul %96, %97, %cst_46 {dimension_numbers = #tpu.dot_dimension_numbers<[1], [0], [0], [1], [0, 0, 1, 1], [], []>} : vector<16x8xf32>, vector<8x32xf32>, vector<16x32xf32> -> vector<16x32xf32>
    %99 = arith.addf %80, %98 : vector<16x32xf32>
    %100 = vector.extract_strided_slice %54 {offsets = [0, 16], sizes = [16, 8], strides = [1, 1]} : vector<16x96xf32> to vector<16x8xf32>
    %101 = vector.extract_strided_slice %54 {offsets = [0, 48], sizes = [16, 8], strides = [1, 1]} : vector<16x96xf32> to vector<16x8xf32>
    %102 = vector.extract_strided_slice %54 {offsets = [0, 80], sizes = [16, 8], strides = [1, 1]} : vector<16x96xf32> to vector<16x8xf32>
    %cst_47 = arith.constant dense<0.000000e+00> : vector<16x16xf32>
    %103 = tpu.matmul %100, %101, %cst_47 {dimension_numbers = #tpu.dot_dimension_numbers<[1], [1], [0], [0], [0, 0, 1, 0], [], []>} : vector<16x8xf32>, vector<16x8xf32>, vector<16x16xf32> -> vector<16x16xf32>
    %104 = arith.addf %103, %47 : vector<16x16xf32>
    %cst_48 = arith.constant dense<0xFF800000> : vector<16xf32>
    %105 = vector.multi_reduction <maximumf>, %104, %cst_48 [1] : vector<16x16xf32> to vector<16xf32>
    %106 = vector.shape_cast %105 : vector<16xf32> to vector<16x1xf32>
    %107 = vector.broadcast %106 : vector<16x1xf32> to vector<16x16xf32>
    %108 = arith.subf %104, %107 : vector<16x16xf32>
    %109 = math.exp %108 : vector<16x16xf32>
    %cst_49 = arith.constant dense<0.000000e+00> : vector<16xf32>
    %110 = vector.multi_reduction <add>, %109, %cst_49 [1] : vector<16x16xf32> to vector<16xf32>
    %111 = vector.shape_cast %110 : vector<16xf32> to vector<16x1xf32>
    %112 = tpu.reciprocal %111 {approx = true} : vector<16x1xf32> -> vector<16x1xf32>
    %113 = vector.broadcast %112 : vector<16x1xf32> to vector<16x16xf32>
    %114 = arith.mulf %109, %113 : vector<16x16xf32>
    %cst_50 = arith.constant dense<0.000000e+00> : vector<16x8xf32>
    %115 = tpu.matmul %114, %102, %cst_50 {dimension_numbers = #tpu.dot_dimension_numbers<[1], [0], [0], [1], [0, 0, 1, 1], [], []>} : vector<16x16xf32>, vector<16x8xf32>, vector<16x8xf32> -> vector<16x8xf32>
    %116 = vector.extract_strided_slice %56 {offsets = [16, 0], sizes = [8, 32], strides = [1, 1]} : vector<32x32xf32> to vector<8x32xf32>
    %cst_51 = arith.constant dense<0.000000e+00> : vector<16x32xf32>
    %117 = tpu.matmul %115, %116, %cst_51 {dimension_numbers = #tpu.dot_dimension_numbers<[1], [0], [0], [1], [0, 0, 1, 1], [], []>} : vector<16x8xf32>, vector<8x32xf32>, vector<16x32xf32> -> vector<16x32xf32>
    %118 = arith.addf %99, %117 : vector<16x32xf32>
    %119 = vector.extract_strided_slice %54 {offsets = [0, 24], sizes = [16, 8], strides = [1, 1]} : vector<16x96xf32> to vector<16x8xf32>
    %120 = vector.extract_strided_slice %54 {offsets = [0, 56], sizes = [16, 8], strides = [1, 1]} : vector<16x96xf32> to vector<16x8xf32>
    %121 = vector.extract_strided_slice %54 {offsets = [0, 88], sizes = [16, 8], strides = [1, 1]} : vector<16x96xf32> to vector<16x8xf32>
    %cst_52 = arith.constant dense<0.000000e+00> : vector<16x16xf32>
    %122 = tpu.matmul %119, %120, %cst_52 {dimension_numbers = #tpu.dot_dimension_numbers<[1], [1], [0], [0], [0, 0, 1, 0], [], []>} : vector<16x8xf32>, vector<16x8xf32>, vector<16x16xf32> -> vector<16x16xf32>
    %123 = arith.addf %122, %47 : vector<16x16xf32>
    %cst_53 = arith.constant dense<0xFF800000> : vector<16xf32>
    %124 = vector.multi_reduction <maximumf>, %123, %cst_53 [1] : vector<16x16xf32> to vector<16xf32>
    %125 = vector.shape_cast %124 : vector<16xf32> to vector<16x1xf32>
    %126 = vector.broadcast %125 : vector<16x1xf32> to vector<16x16xf32>
    %127 = arith.subf %123, %126 : vector<16x16xf32>
    %128 = math.exp %127 : vector<16x16xf32>
    %cst_54 = arith.constant dense<0.000000e+00> : vector<16xf32>
    %129 = vector.multi_reduction <add>, %128, %cst_54 [1] : vector<16x16xf32> to vector<16xf32>
    %130 = vector.shape_cast %129 : vector<16xf32> to vector<16x1xf32>
    %131 = tpu.reciprocal %130 {approx = true} : vector<16x1xf32> -> vector<16x1xf32>
    %132 = vector.broadcast %131 : vector<16x1xf32> to vector<16x16xf32>
    %133 = arith.mulf %128, %132 : vector<16x16xf32>
    %cst_55 = arith.constant dense<0.000000e+00> : vector<16x8xf32>
    %134 = tpu.matmul %133, %121, %cst_55 {dimension_numbers = #tpu.dot_dimension_numbers<[1], [0], [0], [1], [0, 0, 1, 1], [], []>} : vector<16x16xf32>, vector<16x8xf32>, vector<16x8xf32> -> vector<16x8xf32>
    %135 = vector.extract_strided_slice %56 {offsets = [24, 0], sizes = [8, 32], strides = [1, 1]} : vector<32x32xf32> to vector<8x32xf32>
    %cst_56 = arith.constant dense<0.000000e+00> : vector<16x32xf32>
    %136 = tpu.matmul %134, %135, %cst_56 {dimension_numbers = #tpu.dot_dimension_numbers<[1], [0], [0], [1], [0, 0, 1, 1], [], []>} : vector<16x8xf32>, vector<8x32xf32>, vector<16x32xf32> -> vector<16x32xf32>
    %137 = arith.addf %118, %136 : vector<16x32xf32>
    %138 = arith.addf %137, %34 : vector<16x32xf32>
    %c0_57 = arith.constant 0 : index
    %c0_58 = arith.constant 0 : index
    %c0_59 = arith.constant 0 : index
    %139 = vector.load %arg14[%c0_57, %c0_58, %c0_59] : memref<2x1x32xf32, #tpu.memory_space<vmem>>, vector<1x1x32xf32>
    %140 = vector.shape_cast %139 : vector<1x1x32xf32> to vector<1x32xf32>
    %c0_60 = arith.constant 0 : index
    %c0_61 = arith.constant 0 : index
    %c0_62 = arith.constant 0 : index
    %141 = vector.load %arg15[%c0_60, %c0_61, %c0_62] : memref<2x1x32xf32, #tpu.memory_space<vmem>>, vector<1x1x32xf32>
    %142 = vector.shape_cast %141 : vector<1x1x32xf32> to vector<1x32xf32>
    %cst_63 = arith.constant dense<0.000000e+00> : vector<16xf32>
    %143 = vector.multi_reduction <add>, %138, %cst_63 [1] : vector<16x32xf32> to vector<16xf32>
    %144 = vector.shape_cast %143 : vector<16xf32> to vector<16x1xf32>
    %cst_64 = arith.constant 3.200000e+01 : f32
    %145 = vector.broadcast %cst_64 : f32 to vector<16x1xf32>
    %146 = arith.divf %144, %145 : vector<16x1xf32>
    %147 = vector.broadcast %146 : vector<16x1xf32> to vector<16x32xf32>
    %148 = arith.subf %138, %147 : vector<16x32xf32>
    %149 = arith.mulf %148, %148 : vector<16x32xf32>
    %cst_65 = arith.constant dense<0.000000e+00> : vector<16xf32>
    %150 = vector.multi_reduction <add>, %149, %cst_65 [1] : vector<16x32xf32> to vector<16xf32>
    %151 = vector.shape_cast %150 : vector<16xf32> to vector<16x1xf32>
    %cst_66 = arith.constant 3.200000e+01 : f32
    %152 = vector.broadcast %cst_66 : f32 to vector<16x1xf32>
    %153 = arith.divf %151, %152 : vector<16x1xf32>
    %154 = vector.broadcast %146 : vector<16x1xf32> to vector<16x32xf32>
    %155 = arith.subf %138, %154 : vector<16x32xf32>
    %cst_67 = arith.constant 9.99999996E-13 : f32
    %156 = vector.broadcast %cst_67 : f32 to vector<16x1xf32>
    %157 = arith.addf %153, %156 : vector<16x1xf32>
    %158 = math.rsqrt %157 : vector<16x1xf32>
    %159 = vector.broadcast %158 : vector<16x1xf32> to vector<16x32xf32>
    %160 = arith.mulf %155, %159 : vector<16x32xf32>
    %161 = vector.broadcast %140 : vector<1x32xf32> to vector<16x32xf32>
    %162 = arith.mulf %160, %161 : vector<16x32xf32>
    %163 = vector.broadcast %142 : vector<1x32xf32> to vector<16x32xf32>
    %164 = arith.addf %162, %163 : vector<16x32xf32>
    %c0_68 = arith.constant 0 : index
    %c0_69 = arith.constant 0 : index
    %c0_70 = arith.constant 0 : index
    %165 = vector.load %arg16[%c0_68, %c0_69, %c0_70] : memref<2x32x64xf32, #tpu.memory_space<vmem>>, vector<1x32x64xf32>
    %166 = vector.shape_cast %165 : vector<1x32x64xf32> to vector<32x64xf32>
    %cst_71 = arith.constant dense<0.000000e+00> : vector<16x64xf32>
    %167 = tpu.matmul %164, %166, %cst_71 {dimension_numbers = #tpu.dot_dimension_numbers<[1], [0], [0], [1], [0, 0, 1, 1], [], []>} : vector<16x32xf32>, vector<32x64xf32>, vector<16x64xf32> -> vector<16x64xf32>
    %c0_72 = arith.constant 0 : index
    %c0_73 = arith.constant 0 : index
    %c0_74 = arith.constant 0 : index
    %168 = vector.load %arg17[%c0_72, %c0_73, %c0_74] : memref<2x1x64xf32, #tpu.memory_space<vmem>>, vector<1x1x64xf32>
    %169 = vector.shape_cast %168 : vector<1x1x64xf32> to vector<1x64xf32>
    %170 = vector.broadcast %169 : vector<1x64xf32> to vector<16x64xf32>
    %171 = arith.addf %167, %170 : vector<16x64xf32>
    %cst_75 = arith.constant 5.000000e-01 : f32
    %172 = vector.broadcast %cst_75 : f32 to vector<16x64xf32>
    %173 = arith.mulf %172, %171 : vector<16x64xf32>
    %cst_76 = arith.constant 4.471500e-02 : f32
    %174 = vector.broadcast %cst_76 : f32 to vector<16x64xf32>
    %175 = arith.mulf %174, %171 : vector<16x64xf32>
    %176 = arith.mulf %175, %171 : vector<16x64xf32>
    %177 = arith.mulf %176, %171 : vector<16x64xf32>
    %178 = arith.addf %171, %177 : vector<16x64xf32>
    %cst_77 = arith.constant 0.797884583 : f32
    %179 = vector.broadcast %cst_77 : f32 to vector<16x64xf32>
    %180 = arith.mulf %179, %178 : vector<16x64xf32>
    %181 = math.tanh %180 : vector<16x64xf32>
    %cst_78 = arith.constant 1.000000e+00 : f32
    %182 = vector.broadcast %cst_78 : f32 to vector<16x64xf32>
    %183 = arith.addf %182, %181 : vector<16x64xf32>
    %184 = arith.mulf %173, %183 : vector<16x64xf32>
    %c0_79 = arith.constant 0 : index
    %c0_80 = arith.constant 0 : index
    %c0_81 = arith.constant 0 : index
    %185 = vector.load %arg18[%c0_79, %c0_80, %c0_81] : memref<2x64x32xf32, #tpu.memory_space<vmem>>, vector<1x64x32xf32>
    %186 = vector.shape_cast %185 : vector<1x64x32xf32> to vector<64x32xf32>
    %cst_82 = arith.constant dense<0.000000e+00> : vector<16x32xf32>
    %187 = tpu.matmul %184, %186, %cst_82 {dimension_numbers = #tpu.dot_dimension_numbers<[1], [0], [0], [1], [0, 0, 1, 1], [], []>} : vector<16x64xf32>, vector<64x32xf32>, vector<16x32xf32> -> vector<16x32xf32>
    %c0_83 = arith.constant 0 : index
    %c0_84 = arith.constant 0 : index
    %c0_85 = arith.constant 0 : index
    %188 = vector.load %arg19[%c0_83, %c0_84, %c0_85] : memref<2x1x32xf32, #tpu.memory_space<vmem>>, vector<1x1x32xf32>
    %189 = vector.shape_cast %188 : vector<1x1x32xf32> to vector<1x32xf32>
    %190 = vector.broadcast %189 : vector<1x32xf32> to vector<16x32xf32>
    %191 = arith.addf %187, %190 : vector<16x32xf32>
    %192 = arith.addf %191, %164 : vector<16x32xf32>
    %c0_86 = arith.constant 0 : index
    %c0_87 = arith.constant 0 : index
    %c0_88 = arith.constant 0 : index
    %193 = vector.load %arg20[%c0_86, %c0_87, %c0_88] : memref<2x1x32xf32, #tpu.memory_space<vmem>>, vector<1x1x32xf32>
    %194 = vector.shape_cast %193 : vector<1x1x32xf32> to vector<1x32xf32>
    %c0_89 = arith.constant 0 : index
    %c0_90 = arith.constant 0 : index
    %c0_91 = arith.constant 0 : index
    %195 = vector.load %arg21[%c0_89, %c0_90, %c0_91] : memref<2x1x32xf32, #tpu.memory_space<vmem>>, vector<1x1x32xf32>
    %196 = vector.shape_cast %195 : vector<1x1x32xf32> to vector<1x32xf32>
    %cst_92 = arith.constant dense<0.000000e+00> : vector<16xf32>
    %197 = vector.multi_reduction <add>, %192, %cst_92 [1] : vector<16x32xf32> to vector<16xf32>
    %198 = vector.shape_cast %197 : vector<16xf32> to vector<16x1xf32>
    %cst_93 = arith.constant 3.200000e+01 : f32
    %199 = vector.broadcast %cst_93 : f32 to vector<16x1xf32>
    %200 = arith.divf %198, %199 : vector<16x1xf32>
    %201 = vector.broadcast %200 : vector<16x1xf32> to vector<16x32xf32>
    %202 = arith.subf %192, %201 : vector<16x32xf32>
    %203 = arith.mulf %202, %202 : vector<16x32xf32>
    %cst_94 = arith.constant dense<0.000000e+00> : vector<16xf32>
    %204 = vector.multi_reduction <add>, %203, %cst_94 [1] : vector<16x32xf32> to vector<16xf32>
    %205 = vector.shape_cast %204 : vector<16xf32> to vector<16x1xf32>
    %cst_95 = arith.constant 3.200000e+01 : f32
    %206 = vector.broadcast %cst_95 : f32 to vector<16x1xf32>
    %207 = arith.divf %205, %206 : vector<16x1xf32>
    %208 = vector.broadcast %200 : vector<16x1xf32> to vector<16x32xf32>
    %209 = arith.subf %192, %208 : vector<16x32xf32>
    %cst_96 = arith.constant 9.99999996E-13 : f32
    %210 = vector.broadcast %cst_96 : f32 to vector<16x1xf32>
    %211 = arith.addf %207, %210 : vector<16x1xf32>
    %212 = math.rsqrt %211 : vector<16x1xf32>
    %213 = vector.broadcast %212 : vector<16x1xf32> to vector<16x32xf32>
    %214 = arith.mulf %209, %213 : vector<16x32xf32>
    %215 = vector.broadcast %194 : vector<1x32xf32> to vector<16x32xf32>
    %216 = arith.mulf %214, %215 : vector<16x32xf32>
    %217 = vector.broadcast %196 : vector<1x32xf32> to vector<16x32xf32>
    %218 = arith.addf %216, %217 : vector<16x32xf32>
    %c1 = arith.constant 1 : index
    %c0_97 = arith.constant 0 : index
    %c0_98 = arith.constant 0 : index
    %219 = vector.load %arg10[%c1, %c0_97, %c0_98] : memref<2x32x96xf32, #tpu.memory_space<vmem>>, vector<1x32x96xf32>
    %220 = vector.shape_cast %219 : vector<1x32x96xf32> to vector<32x96xf32>
    %cst_99 = arith.constant dense<0.000000e+00> : vector<16x96xf32>
    %221 = tpu.matmul %218, %220, %cst_99 {dimension_numbers = #tpu.dot_dimension_numbers<[1], [0], [0], [1], [0, 0, 1, 1], [], []>} : vector<16x32xf32>, vector<32x96xf32>, vector<16x96xf32> -> vector<16x96xf32>
    %c1_100 = arith.constant 1 : index
    %c0_101 = arith.constant 0 : index
    %c0_102 = arith.constant 0 : index
    %222 = vector.load %arg11[%c1_100, %c0_101, %c0_102] : memref<2x1x96xf32, #tpu.memory_space<vmem>>, vector<1x1x96xf32>
    %223 = vector.shape_cast %222 : vector<1x1x96xf32> to vector<1x96xf32>
    %224 = vector.broadcast %223 : vector<1x96xf32> to vector<16x96xf32>
    %225 = arith.addf %221, %224 : vector<16x96xf32>
    %c1_103 = arith.constant 1 : index
    %c0_104 = arith.constant 0 : index
    %c0_105 = arith.constant 0 : index
    %226 = vector.load %arg12[%c1_103, %c0_104, %c0_105] : memref<2x32x32xf32, #tpu.memory_space<vmem>>, vector<1x32x32xf32>
    %227 = vector.shape_cast %226 : vector<1x32x32xf32> to vector<32x32xf32>
    %cst_106 = arith.constant 0.000000e+00 : f32
    %228 = vector.broadcast %cst_106 : f32 to vector<16x32xf32>
    %c1_107 = arith.constant 1 : index
    %c0_108 = arith.constant 0 : index
    %c0_109 = arith.constant 0 : index
    %229 = vector.load %arg13[%c1_107, %c0_108, %c0_109] : memref<2x1x32xf32, #tpu.memory_space<vmem>>, vector<1x1x32xf32>
    %230 = vector.shape_cast %229 : vector<1x1x32xf32> to vector<1x32xf32>
    %231 = vector.broadcast %230 : vector<1x32xf32> to vector<16x32xf32>
    %232 = arith.addf %228, %231 : vector<16x32xf32>
    %233 = vector.extract_strided_slice %225 {offsets = [0, 0], sizes = [16, 8], strides = [1, 1]} : vector<16x96xf32> to vector<16x8xf32>
    %234 = vector.extract_strided_slice %225 {offsets = [0, 32], sizes = [16, 8], strides = [1, 1]} : vector<16x96xf32> to vector<16x8xf32>
    %235 = vector.extract_strided_slice %225 {offsets = [0, 64], sizes = [16, 8], strides = [1, 1]} : vector<16x96xf32> to vector<16x8xf32>
    %cst_110 = arith.constant dense<0.000000e+00> : vector<16x16xf32>
    %236 = tpu.matmul %233, %234, %cst_110 {dimension_numbers = #tpu.dot_dimension_numbers<[1], [1], [0], [0], [0, 0, 1, 0], [], []>} : vector<16x8xf32>, vector<16x8xf32>, vector<16x16xf32> -> vector<16x16xf32>
    %237 = arith.addf %236, %47 : vector<16x16xf32>
    %cst_111 = arith.constant dense<0xFF800000> : vector<16xf32>
    %238 = vector.multi_reduction <maximumf>, %237, %cst_111 [1] : vector<16x16xf32> to vector<16xf32>
    %239 = vector.shape_cast %238 : vector<16xf32> to vector<16x1xf32>
    %240 = vector.broadcast %239 : vector<16x1xf32> to vector<16x16xf32>
    %241 = arith.subf %237, %240 : vector<16x16xf32>
    %242 = math.exp %241 : vector<16x16xf32>
    %cst_112 = arith.constant dense<0.000000e+00> : vector<16xf32>
    %243 = vector.multi_reduction <add>, %242, %cst_112 [1] : vector<16x16xf32> to vector<16xf32>
    %244 = vector.shape_cast %243 : vector<16xf32> to vector<16x1xf32>
    %245 = tpu.reciprocal %244 {approx = true} : vector<16x1xf32> -> vector<16x1xf32>
    %246 = vector.broadcast %245 : vector<16x1xf32> to vector<16x16xf32>
    %247 = arith.mulf %242, %246 : vector<16x16xf32>
    %cst_113 = arith.constant dense<0.000000e+00> : vector<16x8xf32>
    %248 = tpu.matmul %247, %235, %cst_113 {dimension_numbers = #tpu.dot_dimension_numbers<[1], [0], [0], [1], [0, 0, 1, 1], [], []>} : vector<16x16xf32>, vector<16x8xf32>, vector<16x8xf32> -> vector<16x8xf32>
    %249 = vector.extract_strided_slice %227 {offsets = [0, 0], sizes = [8, 32], strides = [1, 1]} : vector<32x32xf32> to vector<8x32xf32>
    %cst_114 = arith.constant dense<0.000000e+00> : vector<16x32xf32>
    %250 = tpu.matmul %248, %249, %cst_114 {dimension_numbers = #tpu.dot_dimension_numbers<[1], [0], [0], [1], [0, 0, 1, 1], [], []>} : vector<16x8xf32>, vector<8x32xf32>, vector<16x32xf32> -> vector<16x32xf32>
    %251 = arith.addf %232, %250 : vector<16x32xf32>
    %252 = vector.extract_strided_slice %225 {offsets = [0, 8], sizes = [16, 8], strides = [1, 1]} : vector<16x96xf32> to vector<16x8xf32>
    %253 = vector.extract_strided_slice %225 {offsets = [0, 40], sizes = [16, 8], strides = [1, 1]} : vector<16x96xf32> to vector<16x8xf32>
    %254 = vector.extract_strided_slice %225 {offsets = [0, 72], sizes = [16, 8], strides = [1, 1]} : vector<16x96xf32> to vector<16x8xf32>
    %cst_115 = arith.constant dense<0.000000e+00> : vector<16x16xf32>
    %255 = tpu.matmul %252, %253, %cst_115 {dimension_numbers = #tpu.dot_dimension_numbers<[1], [1], [0], [0], [0, 0, 1, 0], [], []>} : vector<16x8xf32>, vector<16x8xf32>, vector<16x16xf32> -> vector<16x16xf32>
    %256 = arith.addf %255, %47 : vector<16x16xf32>
    %cst_116 = arith.constant dense<0xFF800000> : vector<16xf32>
    %257 = vector.multi_reduction <maximumf>, %256, %cst_116 [1] : vector<16x16xf32> to vector<16xf32>
    %258 = vector.shape_cast %257 : vector<16xf32> to vector<16x1xf32>
    %259 = vector.broadcast %258 : vector<16x1xf32> to vector<16x16xf32>
    %260 = arith.subf %256, %259 : vector<16x16xf32>
    %261 = math.exp %260 : vector<16x16xf32>
    %cst_117 = arith.constant dense<0.000000e+00> : vector<16xf32>
    %262 = vector.multi_reduction <add>, %261, %cst_117 [1] : vector<16x16xf32> to vector<16xf32>
    %263 = vector.shape_cast %262 : vector<16xf32> to vector<16x1xf32>
    %264 = tpu.reciprocal %263 {approx = true} : vector<16x1xf32> -> vector<16x1xf32>
    %265 = vector.broadcast %264 : vector<16x1xf32> to vector<16x16xf32>
    %266 = arith.mulf %261, %265 : vector<16x16xf32>
    %cst_118 = arith.constant dense<0.000000e+00> : vector<16x8xf32>
    %267 = tpu.matmul %266, %254, %cst_118 {dimension_numbers = #tpu.dot_dimension_numbers<[1], [0], [0], [1], [0, 0, 1, 1], [], []>} : vector<16x16xf32>, vector<16x8xf32>, vector<16x8xf32> -> vector<16x8xf32>
    %268 = vector.extract_strided_slice %227 {offsets = [8, 0], sizes = [8, 32], strides = [1, 1]} : vector<32x32xf32> to vector<8x32xf32>
    %cst_119 = arith.constant dense<0.000000e+00> : vector<16x32xf32>
    %269 = tpu.matmul %267, %268, %cst_119 {dimension_numbers = #tpu.dot_dimension_numbers<[1], [0], [0], [1], [0, 0, 1, 1], [], []>} : vector<16x8xf32>, vector<8x32xf32>, vector<16x32xf32> -> vector<16x32xf32>
    %270 = arith.addf %251, %269 : vector<16x32xf32>
    %271 = vector.extract_strided_slice %225 {offsets = [0, 16], sizes = [16, 8], strides = [1, 1]} : vector<16x96xf32> to vector<16x8xf32>
    %272 = vector.extract_strided_slice %225 {offsets = [0, 48], sizes = [16, 8], strides = [1, 1]} : vector<16x96xf32> to vector<16x8xf32>
    %273 = vector.extract_strided_slice %225 {offsets = [0, 80], sizes = [16, 8], strides = [1, 1]} : vector<16x96xf32> to vector<16x8xf32>
    %cst_120 = arith.constant dense<0.000000e+00> : vector<16x16xf32>
    %274 = tpu.matmul %271, %272, %cst_120 {dimension_numbers = #tpu.dot_dimension_numbers<[1], [1], [0], [0], [0, 0, 1, 0], [], []>} : vector<16x8xf32>, vector<16x8xf32>, vector<16x16xf32> -> vector<16x16xf32>
    %275 = arith.addf %274, %47 : vector<16x16xf32>
    %cst_121 = arith.constant dense<0xFF800000> : vector<16xf32>
    %276 = vector.multi_reduction <maximumf>, %275, %cst_121 [1] : vector<16x16xf32> to vector<16xf32>
    %277 = vector.shape_cast %276 : vector<16xf32> to vector<16x1xf32>
    %278 = vector.broadcast %277 : vector<16x1xf32> to vector<16x16xf32>
    %279 = arith.subf %275, %278 : vector<16x16xf32>
    %280 = math.exp %279 : vector<16x16xf32>
    %cst_122 = arith.constant dense<0.000000e+00> : vector<16xf32>
    %281 = vector.multi_reduction <add>, %280, %cst_122 [1] : vector<16x16xf32> to vector<16xf32>
    %282 = vector.shape_cast %281 : vector<16xf32> to vector<16x1xf32>
    %283 = tpu.reciprocal %282 {approx = true} : vector<16x1xf32> -> vector<16x1xf32>
    %284 = vector.broadcast %283 : vector<16x1xf32> to vector<16x16xf32>
    %285 = arith.mulf %280, %284 : vector<16x16xf32>
    %cst_123 = arith.constant dense<0.000000e+00> : vector<16x8xf32>
    %286 = tpu.matmul %285, %273, %cst_123 {dimension_numbers = #tpu.dot_dimension_numbers<[1], [0], [0], [1], [0, 0, 1, 1], [], []>} : vector<16x16xf32>, vector<16x8xf32>, vector<16x8xf32> -> vector<16x8xf32>
    %287 = vector.extract_strided_slice %227 {offsets = [16, 0], sizes = [8, 32], strides = [1, 1]} : vector<32x32xf32> to vector<8x32xf32>
    %cst_124 = arith.constant dense<0.000000e+00> : vector<16x32xf32>
    %288 = tpu.matmul %286, %287, %cst_124 {dimension_numbers = #tpu.dot_dimension_numbers<[1], [0], [0], [1], [0, 0, 1, 1], [], []>} : vector<16x8xf32>, vector<8x32xf32>, vector<16x32xf32> -> vector<16x32xf32>
    %289 = arith.addf %270, %288 : vector<16x32xf32>
    %290 = vector.extract_strided_slice %225 {offsets = [0, 24], sizes = [16, 8], strides = [1, 1]} : vector<16x96xf32> to vector<16x8xf32>
    %291 = vector.extract_strided_slice %225 {offsets = [0, 56], sizes = [16, 8], strides = [1, 1]} : vector<16x96xf32> to vector<16x8xf32>
    %292 = vector.extract_strided_slice %225 {offsets = [0, 88], sizes = [16, 8], strides = [1, 1]} : vector<16x96xf32> to vector<16x8xf32>
    %cst_125 = arith.constant dense<0.000000e+00> : vector<16x16xf32>
    %293 = tpu.matmul %290, %291, %cst_125 {dimension_numbers = #tpu.dot_dimension_numbers<[1], [1], [0], [0], [0, 0, 1, 0], [], []>} : vector<16x8xf32>, vector<16x8xf32>, vector<16x16xf32> -> vector<16x16xf32>
    %294 = arith.addf %293, %47 : vector<16x16xf32>
    %cst_126 = arith.constant dense<0xFF800000> : vector<16xf32>
    %295 = vector.multi_reduction <maximumf>, %294, %cst_126 [1] : vector<16x16xf32> to vector<16xf32>
    %296 = vector.shape_cast %295 : vector<16xf32> to vector<16x1xf32>
    %297 = vector.broadcast %296 : vector<16x1xf32> to vector<16x16xf32>
    %298 = arith.subf %294, %297 : vector<16x16xf32>
    %299 = math.exp %298 : vector<16x16xf32>
    %cst_127 = arith.constant dense<0.000000e+00> : vector<16xf32>
    %300 = vector.multi_reduction <add>, %299, %cst_127 [1] : vector<16x16xf32> to vector<16xf32>
    %301 = vector.shape_cast %300 : vector<16xf32> to vector<16x1xf32>
    %302 = tpu.reciprocal %301 {approx = true} : vector<16x1xf32> -> vector<16x1xf32>
    %303 = vector.broadcast %302 : vector<16x1xf32> to vector<16x16xf32>
    %304 = arith.mulf %299, %303 : vector<16x16xf32>
    %cst_128 = arith.constant dense<0.000000e+00> : vector<16x8xf32>
    %305 = tpu.matmul %304, %292, %cst_128 {dimension_numbers = #tpu.dot_dimension_numbers<[1], [0], [0], [1], [0, 0, 1, 1], [], []>} : vector<16x16xf32>, vector<16x8xf32>, vector<16x8xf32> -> vector<16x8xf32>
    %306 = vector.extract_strided_slice %227 {offsets = [24, 0], sizes = [8, 32], strides = [1, 1]} : vector<32x32xf32> to vector<8x32xf32>
    %cst_129 = arith.constant dense<0.000000e+00> : vector<16x32xf32>
    %307 = tpu.matmul %305, %306, %cst_129 {dimension_numbers = #tpu.dot_dimension_numbers<[1], [0], [0], [1], [0, 0, 1, 1], [], []>} : vector<16x8xf32>, vector<8x32xf32>, vector<16x32xf32> -> vector<16x32xf32>
    %308 = arith.addf %289, %307 : vector<16x32xf32>
    %309 = arith.addf %308, %218 : vector<16x32xf32>
    %c1_130 = arith.constant 1 : index
    %c0_131 = arith.constant 0 : index
    %c0_132 = arith.constant 0 : index
    %310 = vector.load %arg14[%c1_130, %c0_131, %c0_132] : memref<2x1x32xf32, #tpu.memory_space<vmem>>, vector<1x1x32xf32>
    %311 = vector.shape_cast %310 : vector<1x1x32xf32> to vector<1x32xf32>
    %c1_133 = arith.constant 1 : index
    %c0_134 = arith.constant 0 : index
    %c0_135 = arith.constant 0 : index
    %312 = vector.load %arg15[%c1_133, %c0_134, %c0_135] : memref<2x1x32xf32, #tpu.memory_space<vmem>>, vector<1x1x32xf32>
    %313 = vector.shape_cast %312 : vector<1x1x32xf32> to vector<1x32xf32>
    %cst_136 = arith.constant dense<0.000000e+00> : vector<16xf32>
    %314 = vector.multi_reduction <add>, %309, %cst_136 [1] : vector<16x32xf32> to vector<16xf32>
    %315 = vector.shape_cast %314 : vector<16xf32> to vector<16x1xf32>
    %cst_137 = arith.constant 3.200000e+01 : f32
    %316 = vector.broadcast %cst_137 : f32 to vector<16x1xf32>
    %317 = arith.divf %315, %316 : vector<16x1xf32>
    %318 = vector.broadcast %317 : vector<16x1xf32> to vector<16x32xf32>
    %319 = arith.subf %309, %318 : vector<16x32xf32>
    %320 = arith.mulf %319, %319 : vector<16x32xf32>
    %cst_138 = arith.constant dense<0.000000e+00> : vector<16xf32>
    %321 = vector.multi_reduction <add>, %320, %cst_138 [1] : vector<16x32xf32> to vector<16xf32>
    %322 = vector.shape_cast %321 : vector<16xf32> to vector<16x1xf32>
    %cst_139 = arith.constant 3.200000e+01 : f32
    %323 = vector.broadcast %cst_139 : f32 to vector<16x1xf32>
    %324 = arith.divf %322, %323 : vector<16x1xf32>
    %325 = vector.broadcast %317 : vector<16x1xf32> to vector<16x32xf32>
    %326 = arith.subf %309, %325 : vector<16x32xf32>
    %cst_140 = arith.constant 9.99999996E-13 : f32
    %327 = vector.broadcast %cst_140 : f32 to vector<16x1xf32>
    %328 = arith.addf %324, %327 : vector<16x1xf32>
    %329 = math.rsqrt %328 : vector<16x1xf32>
    %330 = vector.broadcast %329 : vector<16x1xf32> to vector<16x32xf32>
    %331 = arith.mulf %326, %330 : vector<16x32xf32>
    %332 = vector.broadcast %311 : vector<1x32xf32> to vector<16x32xf32>
    %333 = arith.mulf %331, %332 : vector<16x32xf32>
    %334 = vector.broadcast %313 : vector<1x32xf32> to vector<16x32xf32>
    %335 = arith.addf %333, %334 : vector<16x32xf32>
    %c1_141 = arith.constant 1 : index
    %c0_142 = arith.constant 0 : index
    %c0_143 = arith.constant 0 : index
    %336 = vector.load %arg16[%c1_141, %c0_142, %c0_143] : memref<2x32x64xf32, #tpu.memory_space<vmem>>, vector<1x32x64xf32>
    %337 = vector.shape_cast %336 : vector<1x32x64xf32> to vector<32x64xf32>
    %cst_144 = arith.constant dense<0.000000e+00> : vector<16x64xf32>
    %338 = tpu.matmul %335, %337, %cst_144 {dimension_numbers = #tpu.dot_dimension_numbers<[1], [0], [0], [1], [0, 0, 1, 1], [], []>} : vector<16x32xf32>, vector<32x64xf32>, vector<16x64xf32> -> vector<16x64xf32>
    %c1_145 = arith.constant 1 : index
    %c0_146 = arith.constant 0 : index
    %c0_147 = arith.constant 0 : index
    %339 = vector.load %arg17[%c1_145, %c0_146, %c0_147] : memref<2x1x64xf32, #tpu.memory_space<vmem>>, vector<1x1x64xf32>
    %340 = vector.shape_cast %339 : vector<1x1x64xf32> to vector<1x64xf32>
    %341 = vector.broadcast %340 : vector<1x64xf32> to vector<16x64xf32>
    %342 = arith.addf %338, %341 : vector<16x64xf32>
    %cst_148 = arith.constant 5.000000e-01 : f32
    %343 = vector.broadcast %cst_148 : f32 to vector<16x64xf32>
    %344 = arith.mulf %343, %342 : vector<16x64xf32>
    %cst_149 = arith.constant 4.471500e-02 : f32
    %345 = vector.broadcast %cst_149 : f32 to vector<16x64xf32>
    %346 = arith.mulf %345, %342 : vector<16x64xf32>
    %347 = arith.mulf %346, %342 : vector<16x64xf32>
    %348 = arith.mulf %347, %342 : vector<16x64xf32>
    %349 = arith.addf %342, %348 : vector<16x64xf32>
    %cst_150 = arith.constant 0.797884583 : f32
    %350 = vector.broadcast %cst_150 : f32 to vector<16x64xf32>
    %351 = arith.mulf %350, %349 : vector<16x64xf32>
    %352 = math.tanh %351 : vector<16x64xf32>
    %cst_151 = arith.constant 1.000000e+00 : f32
    %353 = vector.broadcast %cst_151 : f32 to vector<16x64xf32>
    %354 = arith.addf %353, %352 : vector<16x64xf32>
    %355 = arith.mulf %344, %354 : vector<16x64xf32>
    %c1_152 = arith.constant 1 : index
    %c0_153 = arith.constant 0 : index
    %c0_154 = arith.constant 0 : index
    %356 = vector.load %arg18[%c1_152, %c0_153, %c0_154] : memref<2x64x32xf32, #tpu.memory_space<vmem>>, vector<1x64x32xf32>
    %357 = vector.shape_cast %356 : vector<1x64x32xf32> to vector<64x32xf32>
    %cst_155 = arith.constant dense<0.000000e+00> : vector<16x32xf32>
    %358 = tpu.matmul %355, %357, %cst_155 {dimension_numbers = #tpu.dot_dimension_numbers<[1], [0], [0], [1], [0, 0, 1, 1], [], []>} : vector<16x64xf32>, vector<64x32xf32>, vector<16x32xf32> -> vector<16x32xf32>
    %c1_156 = arith.constant 1 : index
    %c0_157 = arith.constant 0 : index
    %c0_158 = arith.constant 0 : index
    %359 = vector.load %arg19[%c1_156, %c0_157, %c0_158] : memref<2x1x32xf32, #tpu.memory_space<vmem>>, vector<1x1x32xf32>
    %360 = vector.shape_cast %359 : vector<1x1x32xf32> to vector<1x32xf32>
    %361 = vector.broadcast %360 : vector<1x32xf32> to vector<16x32xf32>
    %362 = arith.addf %358, %361 : vector<16x32xf32>
    %363 = arith.addf %362, %335 : vector<16x32xf32>
    %c1_159 = arith.constant 1 : index
    %c0_160 = arith.constant 0 : index
    %c0_161 = arith.constant 0 : index
    %364 = vector.load %arg20[%c1_159, %c0_160, %c0_161] : memref<2x1x32xf32, #tpu.memory_space<vmem>>, vector<1x1x32xf32>
    %365 = vector.shape_cast %364 : vector<1x1x32xf32> to vector<1x32xf32>
    %c1_162 = arith.constant 1 : index
    %c0_163 = arith.constant 0 : index
    %c0_164 = arith.constant 0 : index
    %366 = vector.load %arg21[%c1_162, %c0_163, %c0_164] : memref<2x1x32xf32, #tpu.memory_space<vmem>>, vector<1x1x32xf32>
    %367 = vector.shape_cast %366 : vector<1x1x32xf32> to vector<1x32xf32>
    %cst_165 = arith.constant dense<0.000000e+00> : vector<16xf32>
    %368 = vector.multi_reduction <add>, %363, %cst_165 [1] : vector<16x32xf32> to vector<16xf32>
    %369 = vector.shape_cast %368 : vector<16xf32> to vector<16x1xf32>
    %cst_166 = arith.constant 3.200000e+01 : f32
    %370 = vector.broadcast %cst_166 : f32 to vector<16x1xf32>
    %371 = arith.divf %369, %370 : vector<16x1xf32>
    %372 = vector.broadcast %371 : vector<16x1xf32> to vector<16x32xf32>
    %373 = arith.subf %363, %372 : vector<16x32xf32>
    %374 = arith.mulf %373, %373 : vector<16x32xf32>
    %cst_167 = arith.constant dense<0.000000e+00> : vector<16xf32>
    %375 = vector.multi_reduction <add>, %374, %cst_167 [1] : vector<16x32xf32> to vector<16xf32>
    %376 = vector.shape_cast %375 : vector<16xf32> to vector<16x1xf32>
    %cst_168 = arith.constant 3.200000e+01 : f32
    %377 = vector.broadcast %cst_168 : f32 to vector<16x1xf32>
    %378 = arith.divf %376, %377 : vector<16x1xf32>
    %379 = vector.broadcast %371 : vector<16x1xf32> to vector<16x32xf32>
    %380 = arith.subf %363, %379 : vector<16x32xf32>
    %cst_169 = arith.constant 9.99999996E-13 : f32
    %381 = vector.broadcast %cst_169 : f32 to vector<16x1xf32>
    %382 = arith.addf %378, %381 : vector<16x1xf32>
    %383 = math.rsqrt %382 : vector<16x1xf32>
    %384 = vector.broadcast %383 : vector<16x1xf32> to vector<16x32xf32>
    %385 = arith.mulf %380, %384 : vector<16x32xf32>
    %386 = vector.broadcast %365 : vector<1x32xf32> to vector<16x32xf32>
    %387 = arith.mulf %385, %386 : vector<16x32xf32>
    %388 = vector.broadcast %367 : vector<1x32xf32> to vector<16x32xf32>
    %389 = arith.addf %387, %388 : vector<16x32xf32>
    %c0_170 = arith.constant 0 : index
    %c0_171 = arith.constant 0 : index
    %390 = vector.load %arg22[%c0_170, %c0_171] : memref<32x128xf32, #tpu.memory_space<vmem>>, vector<32x128xf32>
    %cst_172 = arith.constant dense<0.000000e+00> : vector<16x128xf32>
    %391 = tpu.matmul %389, %390, %cst_172 {dimension_numbers = #tpu.dot_dimension_numbers<[1], [0], [0], [1], [0, 0, 1, 1], [], []>} : vector<16x32xf32>, vector<32x128xf32>, vector<16x128xf32> -> vector<16x128xf32>
    %c0_173 = arith.constant 0 : index
    %c0_174 = arith.constant 0 : index
    %392 = vector.load %arg23[%c0_173, %c0_174] : memref<1x128xf32, #tpu.memory_space<vmem>>, vector<1x128xf32>
    %393 = vector.broadcast %392 : vector<1x128xf32> to vector<16x128xf32>
    %394 = arith.addf %391, %393 : vector<16x128xf32>
    %cst_175 = arith.constant 0.000000e+00 : f32
    %395 = vector.broadcast %cst_175 : f32 to vector<16x128xf32>
    %396 = arith.maximumf %394, %395 : vector<16x128xf32>
    %c0_176 = arith.constant 0 : index
    %c0_177 = arith.constant 0 : index
    %397 = vector.load %arg24[%c0_176, %c0_177] : memref<1x128xf32, #tpu.memory_space<vmem>>, vector<1x128xf32>
    %c0_178 = arith.constant 0 : index
    %c0_179 = arith.constant 0 : index
    %398 = vector.load %arg25[%c0_178, %c0_179] : memref<1x128xf32, #tpu.memory_space<vmem>>, vector<1x128xf32>
    %cst_180 = arith.constant dense<0.000000e+00> : vector<16xf32>
    %399 = vector.multi_reduction <add>, %396, %cst_180 [1] : vector<16x128xf32> to vector<16xf32>
    %400 = vector.shape_cast %399 : vector<16xf32> to vector<16x1xf32>
    %cst_181 = arith.constant 1.280000e+02 : f32
    %401 = vector.broadcast %cst_181 : f32 to vector<16x1xf32>
    %402 = arith.divf %400, %401 : vector<16x1xf32>
    %403 = vector.broadcast %402 : vector<16x1xf32> to vector<16x128xf32>
    %404 = arith.subf %396, %403 : vector<16x128xf32>
    %405 = arith.mulf %404, %404 : vector<16x128xf32>
    %cst_182 = arith.constant dense<0.000000e+00> : vector<16xf32>
    %406 = vector.multi_reduction <add>, %405, %cst_182 [1] : vector<16x128xf32> to vector<16xf32>
    %407 = vector.shape_cast %406 : vector<16xf32> to vector<16x1xf32>
    %cst_183 = arith.constant 1.280000e+02 : f32
    %408 = vector.broadcast %cst_183 : f32 to vector<16x1xf32>
    %409 = arith.divf %407, %408 : vector<16x1xf32>
    %410 = vector.broadcast %402 : vector<16x1xf32> to vector<16x128xf32>
    %411 = arith.subf %396, %410 : vector<16x128xf32>
    %cst_184 = arith.constant 9.99999974E-6 : f32
    %412 = vector.broadcast %cst_184 : f32 to vector<16x1xf32>
    %413 = arith.addf %409, %412 : vector<16x1xf32>
    %414 = math.rsqrt %413 : vector<16x1xf32>
    %415 = vector.broadcast %414 : vector<16x1xf32> to vector<16x128xf32>
    %416 = arith.mulf %411, %415 : vector<16x128xf32>
    %417 = vector.broadcast %397 : vector<1x128xf32> to vector<16x128xf32>
    %418 = arith.mulf %416, %417 : vector<16x128xf32>
    %419 = vector.broadcast %398 : vector<1x128xf32> to vector<16x128xf32>
    %420 = arith.addf %418, %419 : vector<16x128xf32>
    %c0_185 = arith.constant 0 : index
    %c0_186 = arith.constant 0 : index
    %421 = vector.load %arg26[%c0_185, %c0_186] : memref<1x128xf32, #tpu.memory_space<vmem>>, vector<1x128xf32>
    %cst_187 = arith.constant dense<0.000000e+00> : vector<1x16xf32>
    %422 = tpu.matmul %421, %420, %cst_187 {dimension_numbers = #tpu.dot_dimension_numbers<[1], [1], [0], [0], [0, 0, 1, 0], [], []>} : vector<1x128xf32>, vector<16x128xf32>, vector<1x16xf32> -> vector<1x16xf32>
    %c0_188 = arith.constant 0 : index
    %c0_189 = arith.constant 0 : index
    %423 = vector.load %arg27[%c0_188, %c0_189] : memref<1x1xf32, #tpu.memory_space<vmem>>, vector<1x1xf32>
    %424 = vector.broadcast %423 : vector<1x1xf32> to vector<1x16xf32>
    %425 = arith.addf %422, %424 : vector<1x16xf32>
    %c0_190 = arith.constant 0 : index
    %c0_191 = arith.constant 0 : index
    %426 = vector.load %arg28[%c0_190, %c0_191] : memref<1x16xf32, #tpu.memory_space<vmem>>, vector<1x16xf32>
    tpu.vector_store %arg28[%c0_190, %c0_191], %425 {strides = array<i32>} : memref<1x16xf32, #tpu.memory_space<vmem>>, vector<1x16xf32>,
    %c0_192 = arith.constant 0 : index
    %c0_193 = arith.constant 0 : index
    %427 = vector.load %arg5[%c0_192, %c0_193] : memref<1x16xf32, #tpu.memory_space<vmem>>, vector<1x16xf32>
    %c0_194 = arith.constant 0 : index
    %c0_195 = arith.constant 0 : index
    %428 = vector.load %arg4[%c0_194, %c0_195] : memref<1x16xf32, #tpu.memory_space<vmem>>, vector<1x16xf32>
    %cst_196 = arith.constant 0.000000e+00 : f32
    %429 = vector.broadcast %cst_196 : f32 to vector<1x16xf32>
    %430 = arith.maximumf %425, %429 : vector<1x16xf32>
    %431 = arith.mulf %425, %427 : vector<1x16xf32>
    %432 = arith.subf %430, %431 : vector<1x16xf32>
    %433 = math.absf %425 : vector<1x16xf32>
    %cst_197 = arith.constant 0.000000e+00 : f32
    %434 = vector.broadcast %cst_197 : f32 to vector<1x16xf32>
    %435 = arith.subf %434, %433 : vector<1x16xf32>
    %436 = math.exp %435 : vector<1x16xf32>
    %cst_198 = arith.constant 1.000000e+00 : f32
    %437 = vector.broadcast %cst_198 : f32 to vector<1x16xf32>
    %438 = arith.addf %437, %436 : vector<1x16xf32>
    %439 = math.log %438 : vector<1x16xf32>
    %440 = arith.addf %432, %439 : vector<1x16xf32>
    %441 = arith.mulf %440, %428 : vector<1x16xf32>
    %442 = vector.shape_cast %441 : vector<1x16xf32> to vector<1x1x16xf32>
    %cst_199 = arith.constant dense<0.000000e+00> : vector<1xf32>
    %443 = vector.multi_reduction <add>, %442, %cst_199 [1, 2] : vector<1x1x16xf32> to vector<1xf32>
    %444 = vector.shape_cast %443 : vector<1xf32> to vector<1x1x1xf32>
    %445 = vector.extract %444[0, 0, 0] : f32 from vector<1x1x1xf32>
    %446 = vector.shape_cast %428 : vector<1x16xf32> to vector<1x1x16xf32>
    %cst_200 = arith.constant dense<0.000000e+00> : vector<1xf32>
    %447 = vector.multi_reduction <add>, %446, %cst_200 [1, 2] : vector<1x1x16xf32> to vector<1xf32>
    %448 = vector.shape_cast %447 : vector<1xf32> to vector<1x1x1xf32>
    %449 = vector.extract %448[0, 0, 0] : f32 from vector<1x1x1xf32>
    %cst_201 = arith.constant 1.000000e+00 : f32
    %450 = arith.maximumf %449, %cst_201 : f32
    %451 = arith.divf %445, %450 : f32
    %c0_202 = arith.constant 0 : index
    %c0_203 = arith.constant 0 : index
    %452 = memref.load %arg29[%c0_202, %c0_203] : memref<1x1xf32, #tpu.memory_space<smem>>
    memref.store %451, %arg29[%c0_202, %c0_203] : memref<1x1xf32, #tpu.memory_space<smem>>
    return
  }
  func.func @transform_0(%arg0: i32) -> (i32, i32) {
    %c0_i32 = arith.constant 0 : i32
    %c0_i32_0 = arith.constant 0 : i32
    %c0_i32_1 = arith.constant 0 : i32
    return %c0_i32, %c0_i32_0 : i32, i32
  }
  func.func @transform_1(%arg0: i32) -> (i32, i32) {
    %c0_i32 = arith.constant 0 : i32
    %c0_i32_0 = arith.constant 0 : i32
    %c0_i32_1 = arith.constant 0 : i32
    return %c0_i32, %c0_i32_0 : i32, i32
  }
  func.func @transform_2(%arg0: i32) -> (i32, i32) {
    %c0_i32 = arith.constant 0 : i32
    %c0_i32_0 = arith.constant 0 : i32
    %c0_i32_1 = arith.constant 0 : i32
    return %c0_i32, %c0_i32_0 : i32, i32
  }
  func.func @transform_3(%arg0: i32) -> (i32, i32) {
    %c0_i32 = arith.constant 0 : i32
    %c0_i32_0 = arith.constant 0 : i32
    %c0_i32_1 = arith.constant 0 : i32
    return %c0_i32, %c0_i32_0 : i32, i32
  }
  func.func @transform_4(%arg0: i32) -> (i32, i32) {
    %c0_i32 = arith.constant 0 : i32
    %c0_i32_0 = arith.constant 0 : i32
    %c0_i32_1 = arith.constant 0 : i32
    return %c0_i32, %c0_i32_0 : i32, i32
  }
  func.func @transform_5(%arg0: i32) -> (i32, i32) {
    %c0_i32 = arith.constant 0 : i32
    %c0_i32_0 = arith.constant 0 : i32
    %c0_i32_1 = arith.constant 0 : i32
    return %c0_i32, %c0_i32_0 : i32, i32
  }
  func.func @transform_6(%arg0: i32) -> (i32, i32) {
    %c0_i32 = arith.constant 0 : i32
    %c0_i32_0 = arith.constant 0 : i32
    %c0_i32_1 = arith.constant 0 : i32
    return %c0_i32, %c0_i32_0 : i32, i32
  }
  func.func @transform_7(%arg0: i32) -> (i32, i32) {
    %c0_i32 = arith.constant 0 : i32
    %c0_i32_0 = arith.constant 0 : i32
    %c0_i32_1 = arith.constant 0 : i32
    return %c0_i32, %c0_i32_0 : i32, i32
  }
  func.func @transform_8(%arg0: i32) -> (i32, i32) {
    %c0_i32 = arith.constant 0 : i32
    %c0_i32_0 = arith.constant 0 : i32
    %c0_i32_1 = arith.constant 0 : i32
    return %c0_i32, %c0_i32_0 : i32, i32
  }
  func.func @transform_9(%arg0: i32) -> (i32, i32, i32) {
    %c0_i32 = arith.constant 0 : i32
    %c0_i32_0 = arith.constant 0 : i32
    %c0_i32_1 = arith.constant 0 : i32
    %c0_i32_2 = arith.constant 0 : i32
    return %c0_i32, %c0_i32_0, %c0_i32_1 : i32, i32, i32
  }
  func.func @transform_10(%arg0: i32) -> (i32, i32, i32) {
    %c0_i32 = arith.constant 0 : i32
    %c0_i32_0 = arith.constant 0 : i32
    %c0_i32_1 = arith.constant 0 : i32
    %c0_i32_2 = arith.constant 0 : i32
    return %c0_i32, %c0_i32_0, %c0_i32_1 : i32, i32, i32
  }
  func.func @transform_11(%arg0: i32) -> (i32, i32, i32) {
    %c0_i32 = arith.constant 0 : i32
    %c0_i32_0 = arith.constant 0 : i32
    %c0_i32_1 = arith.constant 0 : i32
    %c0_i32_2 = arith.constant 0 : i32
    return %c0_i32, %c0_i32_0, %c0_i32_1 : i32, i32, i32
  }
  func.func @transform_12(%arg0: i32) -> (i32, i32, i32) {
    %c0_i32 = arith.constant 0 : i32
    %c0_i32_0 = arith.constant 0 : i32
    %c0_i32_1 = arith.constant 0 : i32
    %c0_i32_2 = arith.constant 0 : i32
    return %c0_i32, %c0_i32_0, %c0_i32_1 : i32, i32, i32
  }
  func.func @transform_13(%arg0: i32) -> (i32, i32, i32) {
    %c0_i32 = arith.constant 0 : i32
    %c0_i32_0 = arith.constant 0 : i32
    %c0_i32_1 = arith.constant 0 : i32
    %c0_i32_2 = arith.constant 0 : i32
    return %c0_i32, %c0_i32_0, %c0_i32_1 : i32, i32, i32
  }
  func.func @transform_14(%arg0: i32) -> (i32, i32, i32) {
    %c0_i32 = arith.constant 0 : i32
    %c0_i32_0 = arith.constant 0 : i32
    %c0_i32_1 = arith.constant 0 : i32
    %c0_i32_2 = arith.constant 0 : i32
    return %c0_i32, %c0_i32_0, %c0_i32_1 : i32, i32, i32
  }
  func.func @transform_15(%arg0: i32) -> (i32, i32, i32) {
    %c0_i32 = arith.constant 0 : i32
    %c0_i32_0 = arith.constant 0 : i32
    %c0_i32_1 = arith.constant 0 : i32
    %c0_i32_2 = arith.constant 0 : i32
    return %c0_i32, %c0_i32_0, %c0_i32_1 : i32, i32, i32
  }
  func.func @transform_16(%arg0: i32) -> (i32, i32, i32) {
    %c0_i32 = arith.constant 0 : i32
    %c0_i32_0 = arith.constant 0 : i32
    %c0_i32_1 = arith.constant 0 : i32
    %c0_i32_2 = arith.constant 0 : i32
    return %c0_i32, %c0_i32_0, %c0_i32_1 : i32, i32, i32
  }
  func.func @transform_17(%arg0: i32) -> (i32, i32, i32) {
    %c0_i32 = arith.constant 0 : i32
    %c0_i32_0 = arith.constant 0 : i32
    %c0_i32_1 = arith.constant 0 : i32
    %c0_i32_2 = arith.constant 0 : i32
    return %c0_i32, %c0_i32_0, %c0_i32_1 : i32, i32, i32
  }
  func.func @transform_18(%arg0: i32) -> (i32, i32, i32) {
    %c0_i32 = arith.constant 0 : i32
    %c0_i32_0 = arith.constant 0 : i32
    %c0_i32_1 = arith.constant 0 : i32
    %c0_i32_2 = arith.constant 0 : i32
    return %c0_i32, %c0_i32_0, %c0_i32_1 : i32, i32, i32
  }
  func.func @transform_19(%arg0: i32) -> (i32, i32, i32) {
    %c0_i32 = arith.constant 0 : i32
    %c0_i32_0 = arith.constant 0 : i32
    %c0_i32_1 = arith.constant 0 : i32
    %c0_i32_2 = arith.constant 0 : i32
    return %c0_i32, %c0_i32_0, %c0_i32_1 : i32, i32, i32
  }
  func.func @transform_20(%arg0: i32) -> (i32, i32, i32) {
    %c0_i32 = arith.constant 0 : i32
    %c0_i32_0 = arith.constant 0 : i32
    %c0_i32_1 = arith.constant 0 : i32
    %c0_i32_2 = arith.constant 0 : i32
    return %c0_i32, %c0_i32_0, %c0_i32_1 : i32, i32, i32
  }
  func.func @transform_21(%arg0: i32) -> (i32, i32) {
    %c0_i32 = arith.constant 0 : i32
    %c0_i32_0 = arith.constant 0 : i32
    %c0_i32_1 = arith.constant 0 : i32
    return %c0_i32, %c0_i32_0 : i32, i32
  }
  func.func @transform_22(%arg0: i32) -> (i32, i32) {
    %c0_i32 = arith.constant 0 : i32
    %c0_i32_0 = arith.constant 0 : i32
    %c0_i32_1 = arith.constant 0 : i32
    return %c0_i32, %c0_i32_0 : i32, i32
  }
  func.func @transform_23(%arg0: i32) -> (i32, i32) {
    %c0_i32 = arith.constant 0 : i32
    %c0_i32_0 = arith.constant 0 : i32
    %c0_i32_1 = arith.constant 0 : i32
    return %c0_i32, %c0_i32_0 : i32, i32
  }
  func.func @transform_24(%arg0: i32) -> (i32, i32) {
    %c0_i32 = arith.constant 0 : i32
    %c0_i32_0 = arith.constant 0 : i32
    %c0_i32_1 = arith.constant 0 : i32
    return %c0_i32, %c0_i32_0 : i32, i32
  }
  func.func @transform_25(%arg0: i32) -> (i32, i32) {
    %c0_i32 = arith.constant 0 : i32
    %c0_i32_0 = arith.constant 0 : i32
    %c0_i32_1 = arith.constant 0 : i32
    return %c0_i32, %c0_i32_0 : i32, i32
  }
  func.func @transform_26(%arg0: i32) -> (i32, i32) {
    %c0_i32 = arith.constant 0 : i32
    %c0_i32_0 = arith.constant 0 : i32
    %c0_i32_1 = arith.constant 0 : i32
    return %c0_i32, %c0_i32_0 : i32, i32
  }
  func.func @transform_27(%arg0: i32) -> (i32, i32) {
    %c0_i32 = arith.constant 0 : i32
    %c0_i32_0 = arith.constant 0 : i32
    %c0_i32_1 = arith.constant 0 : i32
    return %c0_i32, %c0_i32_0 : i32, i32
  }
  func.func @transform_28(%arg0: i32) -> (i32, i32) {
    %c0_i32 = arith.constant 0 : i32
    %c0_i32_0 = arith.constant 0 : i32
    %c0_i32_1 = arith.constant 0 : i32
    return %c0_i32, %c0_i32_0 : i32, i32
  }
}

</mosaic_0001>

<bundles_post_ra>
// kernel: forward_eval.1
= control target key start
LH: loop header
LB: loop body
LE: loop exit
PB: predicated region body
PF: predicated region fallthrough
CT: control target
= control target key end

     0   :  { %s5360_s0 = inlined_call_operand.vmem [shape: s32[16,1], index: 0, kind: input, shape index: {}]   ;;  %s5361_s1 = inlined_call_operand.vmem [shape: s32[16,1], index: 1, kind: input, shape index: {}]   ;;  %s5362_s2 = inlined_call_operand.vmem [shape: s32[1,16], index: 2, kind: input, shape index: {}]   ;;  %s5363_s3 = inlined_call_operand.vmem [shape: f32[1,16], index: 3, kind: input, shape index: {}]   ;;  %s5364_s4 = inlined_call_operand.vmem [shape: f32[1,16], index: 4, kind: input, shape index: {}]   ;;  %s5365_s5 = inlined_call_operand.vmem [shape: f32[120,32], index: 5, kind: input, shape index: {}]   ;;  %s5366_s6 = inlined_call_operand.vmem [shape: f32[16,32], index: 6, kind: input, shape index: {}]   ;;  %s5367_s7 = inlined_call_operand.vmem [shape: f32[1,32], index: 7, kind: input, shape index: {}]   ;;  %s5368_s8 = inlined_call_operand.vmem [shape: f32[1,32], index: 8, kind: input, shape index: {}]   ;;  %s5369_s9 = inlined_call_operand.vmem [shape: f32[2,32,96], index: 9, kind: input, shape index: {}]   ;;  %s5370_s10 = inlined_call_operand.vmem [shape: f32[2,1,96], index: 10, kind: input, shape index: {}]   ;;  %s5371_s11 = inlined_call_operand.vmem [shape: f32[2,32,32], index: 11, kind: input, shape index: {}]   ;;  %s5372_s12 = inlined_call_operand.vmem [shape: f32[2,1,32], index: 12, kind: input, shape index: {}]   ;;  %s5373_s13 = inlined_call_operand.vmem [shape: f32[2,1,32], index: 13, kind: input, shape index: {}]   ;;  %s5374_s14 = inlined_call_operand.vmem [shape: f32[2,1,32], index: 14, kind: input, shape index: {}]   ;;  %s5375_s15 = inlined_call_operand.vmem [shape: f32[2,32,64], index: 15, kind: input, shape index: {}]   ;;  %s5376_s16 = inlined_call_operand.vmem [shape: f32[2,1,64], index: 16, kind: input, shape index: {}]   ;;  %s5377_s17 = inlined_call_operand.vmem [shape: f32[2,64,32], index: 17, kind: input, shape index: {}]   ;;  %s5378_s18 = inlined_call_operand.vmem [shape: f32[2,1,32], index: 18, kind: input, shape index: {}]   ;;  %s5379_s19 = inlined_call_operand.vmem [shape: f32[2,1,32], index: 19, kind: input, shape index: {}]   ;;  %s5380_s20 = inlined_call_operand.vmem [shape: f32[2,1,32], index: 20, kind: input, shape index: {}]   ;;  %s5381_s21 = inlined_call_operand.vmem [shape: f32[32,128], index: 21, kind: input, shape index: {}]   ;;  %s5382_s22 = inlined_call_operand.vmem [shape: f32[1,128], index: 22, kind: input, shape index: {}]   ;;  %s5383_s23 = inlined_call_operand.vmem [shape: f32[1,128], index: 23, kind: input, shape index: {}]   ;;  %s5384_s24 = inlined_call_operand.vmem [shape: f32[1,128], index: 24, kind: input, shape index: {}]   ;;  %s5385_s25 = inlined_call_operand.vmem [shape: f32[1,128], index: 25, kind: input, shape index: {}]   ;;  %s5386_s26 = inlined_call_operand.<no memory space> [shape: f32[1,1], index: 26, kind: input, shape index: {}]   ;;  %s5387_s27 = inlined_call_operand.vmem [shape: f32[1,16], index: 27, kind: output, shape index: {0}]   ;;  %s5388_s28 = inlined_call_operand.hbm [shape: f32[1,1], index: 28, kind: output, shape index: {1}]  }
   0x1   :  { %5410 = sst [smem:[#allocation6_spill]] %s5360_s0  ;;  %v34_v0 = vstv %s5386_s26 }
   0x2   :  { %5411 = sst [smem:[#allocation7_spill]] %s5361_s1  ;;  %35 = vst [vmem:[#allocation2] sm:$0x1] %v34_v0 }
   0x3   :  { %5412 = sst [smem:[#allocation8_spill]] %s5362_s2 }
   0x4   :  { %5413 = sst [smem:[#allocation9_spill]] %s5363_s3 }
   0x5   :  { %5414 = sst [smem:[#allocation10_spill]] %s5364_s4 }
   0x6   :  { %5415 = sst [smem:[#allocation11_spill]] %s5365_s5 }
   0x7   :  { %5416 = sst [smem:[#allocation12_spill]] %s5366_s6 }
   0x8   :  { %5417 = sst [smem:[#allocation13_spill]] %s5367_s7 }
   0x9   :  { %5418 = sst [smem:[#allocation14_spill]] %s5368_s8 }
   0xa   :  { %5419 = sst [smem:[#allocation15_spill]] %s5369_s9 }
   0xb   :  { %5420 = sst [smem:[#allocation16_spill]] %s5370_s10 }
   0xc   :  { %5421 = sst [smem:[#allocation17_spill]] %s5371_s11 }
   0xd   :  { %5422 = sst [smem:[#allocation18_spill]] %s5372_s12 }
   0xe   :  { %s5423_s3 = sld [smem:[#allocation6_spill]]  ;;  %s5424_s0 = sld [smem:[#allocation11_spill]]  ;;  %v4627_v3 = vmov 0  }
   0xf   :  { %4431 = vset.pattern.permute.xlu0 %v4627_v3  ;;  %4437 = vset.pattern.permute.xlu1 %v4627_v3 }
  0x14   :  { %v91_v1 = vld [vmem:[%s5423_s3] sm:$0xff]  ;;  %v108_v4 = vld [vmem:[%s5424_s0 + $0x8] sm:$0xff]  ;;  %v109_v5 = vld [vmem:[%s5424_s0 + $0x10] sm:$0xff] }
  0x15   :  { %v107_v2 = vld [vmem:[%s5424_s0] sm:$0xff]  ;;  %v110_v6 = vld [vmem:[%s5424_s0 + $0x18] sm:$0xff]  ;;  %96 = vperm.xlu0 %4431, %v91_v1   ;;  %v92_v9 = vld [vmem:[%s5423_s3 + $0x8] sm:$0xff] }
  0x16   :  { %v4208_v7 = vpack.c.bf16 %v108_v4, %v107_v2  ;;  %v4212_v8 = vpack.c.bf16 %v110_v6, %v109_v5  ;;  %v111_v10 = vld [vmem:[%s5424_s0 + $0x20] sm:$0xff]  ;;  %v112_v11 = vld [vmem:[%s5424_s0 + $0x28] sm:$0xff] }
  0x18   :  { %4209 = vmatprep.subr.bf16.mxu0 %v4208_v7 }
  0x19   :  { %4211 = vmatpush3.bf16.msra.mxu0 %v4208_v7 }
  0x1a   :  { %36 = vsyncpa [#allocation4], 0  ;;  %99 = vperm.xlu0 %4431, %v92_v9   ;;  %4213 = vmatprep.subr.bf16.mxu0 %v4212_v8  ;;  %v4216_v12 = vpack.c.bf16 %v112_v11, %v111_v10  ;;  %v113_v13 = vld [vmem:[%s5424_s0 + $0x30] sm:$0xff]  ;;  %v114_v14 = vld [vmem:[%s5424_s0 + $0x38] sm:$0xff]  ;;  %v93_v26 = vlaneseq  ;;  %vm123_vm0 = vcmask 982016   ;;  %v4628_v29 = vmov 0.0  }
  0x1b   :  { %v4220_v15 = vpack.c.bf16 %v114_v14, %v113_v13  ;;  %v115_v16 = vld [vmem:[%s5424_s0 + $0x40] sm:$0xff]  ;;  %v116_v17 = vld [vmem:[%s5424_s0 + $0x48] sm:$0xff]  ;;  %v117_v19 = vld [vmem:[%s5424_s0 + $0x50] sm:$0xff]  ;;  %s5425_s29 = sld [smem:[#allocation12_spill]]  ;;  %vm207_vm3 = vcmask 261120   ;;  %s5426_s26 = sld [smem:[#allocation15_spill]] }
  0x1c   :  { %v4224_v18 = vpack.c.bf16 %v116_v17, %v115_v16  ;;  %v118_v20 = vld [vmem:[%s5424_s0 + $0x58] sm:$0xff]  ;;  %v119_v22 = vld [vmem:[%s5424_s0 + $0x60] sm:$0xff]  ;;  %v120_v23 = vld [vmem:[%s5424_s0 + $0x68] sm:$0xff]  ;;  %v94_v27 = vand.u32 127, %v93_v26  ;;  %s5427_s10 = sld [smem:[#allocation13_spill]]  ;;  %s5429_s7 = sld [smem:[#allocation16_spill]] }
  0x1d   :  { %4215 = vmatpush3.bf16.msra.mxu0 %v4212_v8  ;;  %v4228_v21 = vpack.c.bf16 %v118_v20, %v117_v19  ;;  %v4232_v24 = vpack.c.bf16 %v120_v23, %v119_v22  ;;  %v121_v25 = vld [vmem:[%s5424_s0 + $0x70] sm:$0xff]  ;;  %s5428_s0 = sld [smem:[#allocation14_spill]]  ;;  %vm388_vm4 = vcmask 64512   ;;  %s5409_s12 = smov 96   ;;  %v4919_v23 = vshrl.u32 %v93_v26, 7 }
  0x1e   :  { %4217 = vmatprep.subr.bf16.mxu0 %v4216_v12  ;;  %s5430_s8 = sld [smem:[#allocation7_spill]]  ;;  %vm4905_vm5 = vmpackc.low %vm388_vm4, %vm388_vm4  ;;  %v4630_v26 = vmov -1e+09   ;;  %vm472_vm12 = vcmask 130048   ;;  %s5403_s2 = smov 64   ;;  %vm1685_vm13 = vcmask 523264  }
  0x1f   :  { %s4633_s1 = smov 88   ;;  %s5406_s4 = smov 80   ;;  %vm4642_vm14 = vmmov 0   ;;  %vm3573_vm15 = vcmask 122880  }
  0x20   :  { %s5435_s30 = sld [smem:[#allocation17_spill]]  ;;  %s5402_s6 = smov 72  }
  0x21   :  { %4219 = vmatpush3.bf16.msra.mxu0 %v4216_v12  ;;  %v122_v33 = vld [vmem:[%s5425_s29] sm:$0xff]  ;;  %v279_v51 = vld [vmem:[%s5426_s26 + $0x8] sm:$0xff]  ;;  %v280_v52 = vld [vmem:[%s5426_s26 + $0x10] sm:$0xff]  ;;  %s5407_s29 = smov 120   ;;  %s5400_s11 = smov 104  }
  0x22   :  { %4221 = vmatprep.subr.bf16.mxu0 %v4220_v15  ;;  %v278_v50 = vld [vmem:[%s5426_s26] sm:$0xff]  ;;  %v281_v54 = vld [vmem:[%s5426_s26 + $0x18] sm:$0xff]  ;;  %s5399_s3 = smov 56   ;;  %s5397_s9 = smov 48  }
  0x23   :  { %v4236_v53 = vpack.c.bf16 %v279_v51, %v278_v50  ;;  %v4240_v55 = vpack.c.bf16 %v281_v54, %v280_v52  ;;  %v3637_v63 = vld [vmem:[%s5427_s10] ss:$0 sm:$0xff]  ;;  %s5433_s10 = sld [smem:[#allocation9_spill]]  ;;  %s5437_s5 = smov 96  }
  0x24   :  { %v3638_v1 = vld [vmem:[%s5428_s0] ss:$0 sm:$0xff]  ;;  %v252_v16 = vld [vmem:[%s5430_s8 + $0x8] sm:$0xff]  ;;  %s5434_s0 = sld [smem:[#allocation8_spill]] }
  0x25   :  { %4223 = vmatpush3.bf16.msra.mxu0 %v4220_v15  ;;  %4237 = vmatprep.subr.bf16.mxu1 %v4236_v53  ;;  %v3640_v9 = vld [vmem:[%s5429_s7] ss:$0 sm:$0xff] }
  0x26   :  { %4225 = vmatprep.subr.bf16.mxu0 %v4224_v18  ;;  %4239 = vmatpush3.bf16.msra.mxu1 %v4236_v53  ;;  %v251_v15 = vld [vmem:[%s5430_s8] sm:$0xff]  ;;  %s5404_s8 = smov 112  }
  0x27   :  { %4241 = vmatprep.subr.bf16.mxu1 %v4240_v55 }
  0x29   :  { %4227 = vmatpush3.bf16.msra.mxu0 %v4224_v18  ;;  %v266_v22 = vld [vmem:[%s5433_s10] sm:$0x1] }
  0x2a   :  { %4229 = vmatprep.subr.bf16.mxu0 %v4228_v21  ;;  %4243 = vmatpush3.bf16.msra.mxu1 %v4240_v55  ;;  %vm267_vm6 = vcmp.gt.f32.partialorder %v266_v22, 0.5 }
  0x2d   :  { %4231 = vmatpush3.bf16.msra.mxu0 %v4228_v21 }
  0x2e   :  { %4233 = vmatprep.subr.bf16.mxu0 %v4232_v24 }
  0x31   :  { %4235 = vmatpush3.bf16.msra.mxu0 %v4232_v24 }
  0x32   :  { %3951 = vmatprep.subr.mxu0 %v121_v25 }
  0x35   :  { %3952 = vmatpush3.msra.mxu0 %v121_v25  ;;  %v271_v25 = vsub.s32 0, %v4919_v23 }
  0x94   :  { %v97_v28 = vpop.permute.xlu0 %96 }
  0x95   :  { %vm101_vm1 = vcmp.eq.s32.totalorder %v97_v28, %v94_v27 }
  0x96   :  { %v3633_v30 = vsel %vm101_vm1, 1.0, %v4628_v29 }
  0x97   :  { %3953 = vmatprep.mubr.msk.f32.mxu0 %vm123_vm0, %v3633_v30  ;;  %v3639_v30 = vld [vmem:[%s5434_s0] ss:$0 sm:$0xff]  ;;  %s5398_s0 = smov 40  }
  0x99   :  { %v100_v31 = vpop.permute.xlu0 %99 }
  0x9a   :  { %vm102_vm2 = vcmp.eq.s32.totalorder %v100_v31, %v94_v27  ;;  %v268_v27 = vsel %vm267_vm6, 1, %v4627_v3 }
  0x9b   :  { %v3634_v32 = vsel %vm102_vm2, 1.0, %v4628_v29  ;;  %v272_v28 = vrot.slane %v268_v27, %v271_v25 }
  0x9c   :  { %3954 = vmatmul.mubr.msk.f32.vlgmr.msra.gmra.mrb[0].mxu0 %vm123_vm0, %v3634_v32 }
  0x9d   :  { %vm273_vm7 = vcmp.eq.s32.totalorder %v272_v28, 1 }
 0x16f   :  { %v3955_v34 = vpop.f32.mrb[0].mxu0 }
 0x170   :  { %v196_v35 = vpop.f32.mrb[1].mxu0  ;;  %v202_v37 = vadd.f32 %v3955_v34, %v122_v33 }
 0x171   :  { %v197_v36 = vadd.f32 %v196_v35, %v122_v33 }
 0x172   :  { %v211_v39 = vsel %vm207_vm3, %v202_v37, 0.0 }
 0x173   :  { %v208_v38 = vsel %vm207_vm3, %v197_v36, 0.0 }
 0x174   :  { %209 = vadd.xlane.f32.xlu1 %v208_v38 }
 0x178   :  { %212 = vadd.xlane.f32.xlu1 %v211_v39 }
 0x201   :  { %v210_v40 = vpop.xlane.xlu1 %209 }
 0x202   :  { %v215_v41 = vmul.f32 0.03125, %v210_v40 }
 0x204   :  { %v217_v42 = vsub.f32 %v197_v36, %v215_v41 }
 0x205   :  { %v213_v43 = vpop.xlane.xlu1 %212 }
 0x206   :  { %v216_v44 = vmul.f32 0.03125, %v213_v43  ;;  %v219_v45 = vmul.f32 %v217_v42, %v217_v42 }
 0x208   :  { %v218_v46 = vsub.f32 %v202_v37, %v216_v44  ;;  %v221_v47 = vsel %vm207_vm3, %v219_v45, 0.0 }
 0x209   :  { %222 = vadd.xlane.f32.xlu0 %v221_v47 }
 0x20a   :  { %v220_v48 = vmul.f32 %v218_v46, %v218_v46 }
 0x20c   :  { %v224_v49 = vsel %vm207_vm3, %v220_v48, 0.0 }
 0x20d   :  { %225 = vadd.xlane.f32.xlu1 %v224_v49 }
 0x296   :  { %v223_v56 = vpop.xlane.xlu0 %222 }
 0x297   :  { %v227_v57 = vmul.f32 0.03125, %v223_v56  ;;  %v370_v56 = vld [vmem:[%s5435_s30] sm:$0xff] }
 0x299   :  { %v229_v58 = vadd.f32 1e-12, %v227_v57 }
 0x29a   :  { %v226_v59 = vpop.xlane.xlu1 %225 }
 0x29b   :  { %4513 = vrsqrt.f32 %v229_v58  ;;  %v228_v60 = vmul.f32 0.03125, %v226_v59 }
 0x29d   :  { %v230_v61 = vadd.f32 1e-12, %v228_v60 }
 0x29f   :  { %4515 = vrsqrt.f32 %v230_v61 }
 0x2a5   :  { %v4514_v62 = vpop.eup %4513 }
 0x2a6   :  { %v233_v0 = vmul.f32 %v4514_v62, %v217_v42 }
 0x2a8   :  { %v241_v2 = vmul.f32 %v3637_v63, %v233_v0 }
 0x2a9   :  { %v4516_v4 = vpop.eup %4515 }
 0x2aa   :  { %v234_v5 = vmul.f32 %v4516_v4, %v218_v46  ;;  %v4874_v6 = vadd.f32 %v3638_v1, %v241_v2 }
 0x2ac   :  { %v242_v7 = vmul.f32 %v3637_v63, %v234_v5  ;;  %3964 = vmatprep.mubr.msk.f32.mxu1 %vm207_vm3, %v4874_v6 }
 0x2ae   :  { %v4878_v8 = vadd.f32 %v3638_v1, %v242_v7 }
 0x2b0   :  { %3965 = vmatmul.mubr.msk.f32.vlgmr.msra.gmra.mrb[0].mxu1 %vm207_vm3, %v4878_v8 }
 0x383   :  { %v3966_v10 = vpop.f32.mrb[0].mxu1 }
 0x384   :  { %v4885_v11 = vadd.f32 %v3966_v10, %v3640_v9  ;;  %v361_v12 = vpop.f32.mrb[1].mxu1 }
 0x385   :  { %v4887_v13 = vadd.f32 %v3640_v9, %v361_v12 }
 0x387   :  { %3971 = vmatprep.mubr.msk.f32.mxu1 %vm388_vm4, %v4887_v13  ;;  %v4893_v14 = vpack.i.bf16 %v4885_v11, %v4887_v13 }
 0x389   :  { %4433 = vrot.lane.b32.xlu1 %v4893_v14, %s5409_s12  ;;  %s5442_s12 = smov 72  }
 0x38d   :  { %255 = vperm.xlu1 %4437, %v251_v15  }
 0x391   :  { %258 = vperm.xlu1 %4437, %v252_v16  }
 0x3fb   :  { %v4434_v17 = vpop.permute.xlu1 %4433 }
 0x3fc   :  { %v4436_v18 = vunpack.i.h.bf16 %v4434_v17  ;;  %v4435_v19 = vunpack.i.l.bf16 %v4434_v17 }
 0x3fe   :  { %v4244_v21 = vpack.c.bf16 %v4436_v18, %v4435_v19 }
 0x400   :  { %4246 = vmatprep.subr.msk.bf16.mxu1 %vm4905_vm5, %v4244_v21 }
 0x401   :  { %4249 = vmatpush3.bf16.xpose.msk.msra.mxu1 %vm4905_vm5, %v4244_v21 }
 0x408   :  { %3972 = vmatmul.mubr.msk.f32.vlgmr.msra.gmra.mrb[2].mxu1 %vm388_vm4, %v4885_v11 }
 0x40c   :  { %v256_v24 = vpop.permute.xlu1 %255 }
 0x40d   :  { %vm264_vm9 = vcmp.eq.s32.totalorder %v256_v24, %v3639_v30 }
 0x40e   :  { %vm274_vm11 = vmand %vm264_vm9, %vm273_vm7 }
 0x40f   :  { %v4930_v34 = vsel %vm274_vm11, 0.0, %v4630_v26 }
 0x410   :  { %v259_v31 = vpop.permute.xlu1 %258 }
 0x411   :  { %vm265_vm8 = vcmp.eq.s32.totalorder %v259_v31, %v3639_v30 }
 0x412   :  { %vm275_vm10 = vmand %vm265_vm8, %vm273_vm7 }
 0x413   :  { %v4928_v32 = vsel %vm275_vm10, 0.0, %v4630_v26 }
 0x4db   :  { %v3973_v33 = vpop.f32.mrb[2].mxu1 }
 0x4dc   :  { %v469_v3 = vadd.f32 %v3973_v33, %v4928_v32  ;;  %v463_v35 = vpop.f32.mrb[3].mxu1 }
 0x4dd   :  { %v464_v36 = vadd.f32 %v463_v35, %v4930_v34 }
 0x4de   :  { %v476_v37 = vsel %vm472_vm12, %v469_v3, -inf }
 0x4df   :  { %477 = vmax.xlane.f32.xlu0 %v476_v37  ;;  %v473_v38 = vsel %vm472_vm12, %v464_v36, -inf }
 0x4e0   :  { %474 = vmax.xlane.f32.xlu1 %v473_v38 }
 0x4f1   :  { %665 = vrot.lane.b32.xlu1 %v4887_v13, %s5407_s29 }
 0x56c   :  { %v478_v39 = vpop.xlane.xlu0 %477 }
 0x56d   :  { %v480_v40 = vsub.f32 %v469_v3, %v478_v39  ;;  %v475_v41 = vpop.xlane.xlu1 %474 }
 0x56e   :  { %v479_v42 = vsub.f32 %v464_v36, %v475_v41 }
 0x56f   :  { %v483_v43 = vmul.f32 1.442695, %v480_v40 }
 0x570   :  { %v481_v44 = vmul.f32 1.442695, %v479_v42 }
 0x571   :  { %4517 = vpow2.f32 %v483_v43  ;;  %v666_v15 = vpop.permute.xlu1 %665 }
 0x572   :  { %4519 = vpow2.f32 %v481_v44 }
 0x57b   :  { %v4518_v45 = vpop.eup %4517 }
 0x57c   :  { %v488_v46 = vsel %vm472_vm12, %v4518_v45, 0.0  ;;  %v4520_v47 = vpop.eup %4519 }
 0x57d   :  { %489 = vadd.xlane.f32.xlu0 %v488_v46  ;;  %v485_v48 = vsel %vm472_vm12, %v4520_v47, 0.0 }
 0x581   :  { %486 = vadd.xlane.f32.xlu0 %v485_v48 }
 0x597   :  { %4439 = vrot.lane.b32.xlu0 %v4893_v14, %s5403_s2 }
 0x59b   :  { %4444 = vrot.lane.b32.xlu0 %v4893_v14, %s4633_s1 }
 0x59f   :  { %667 = vrot.lane.b32.xlu0 %v4885_v11, %s5407_s29 }
 0x5a3   :  { %4449 = vrot.lane.b32.xlu0 %v4893_v14, %s5406_s4  ;;  %s5443_s4 = smov 104  }
 0x5a7   :  { %948 = vrot.lane.b32.xlu0 %v4887_v13, %s5404_s8 }
 0x5ab   :  { %950 = vrot.lane.b32.xlu0 %v4885_v11, %s5404_s8  ;;  %s5444_s8 = smov 56  }
 0x60a   :  { %v490_v49 = vpop.xlane.xlu0 %489 }
 0x60b   :  { %4521 = vrcp.f32 %v490_v49 }
 0x60e   :  { %v487_v50 = vpop.xlane.xlu0 %486 }
 0x60f   :  { %4523 = vrcp.f32 %v487_v50 }
 0x612   :  { %v4440_v51 = vpop.permute.xlu0 %4439 }
 0x613   :  { %v4442_v52 = vunpack.i.h.bf16 %v4440_v51  ;;  %v4441_v53 = vunpack.i.l.bf16 %v4440_v51 }
 0x615   :  { %v4250_v54 = vpack.c.bf16 %v4442_v52, %v4441_v53  ;;  %v4522_v57 = vpop.eup %4521 }
 0x616   :  { %v4445_v55 = vpop.permute.xlu0 %4444  ;;  %v494_v63 = vmul.f32 %v4522_v57, %v4518_v45 }
 0x617   :  { %4251 = vmatprep.subr.bf16.mxu1 %v4250_v54  ;;  %v4447_v59 = vunpack.i.h.bf16 %v4445_v55  ;;  %v4446_v60 = vunpack.i.l.bf16 %v4445_v55 }
 0x618   :  { %4253 = vmatpush3.bf16.msra.mxu1 %v4250_v54 }
 0x619   :  { %v4524_v58 = vpop.eup %4523  ;;  %3981 = vmatprep.subr.mxu1 %v370_v56  ;;  %v4254_v0 = vpack.c.bf16 %v4447_v59, %v4446_v60 }
 0x61a   :  { %v668_v61 = vpop.permute.xlu0 %667  ;;  %v493_v62 = vmul.f32 %v4524_v58, %v4520_v47 }
 0x61c   :  { %3978 = vmatprep.mubr.msk.f32.mxu1 %vm472_vm12, %v493_v62 }
 0x61d   :  { %3979 = vmatmul.mubr.msk.f32.vlgmr.msra.gmra.mrb[4].mxu1 %vm472_vm12, %v494_v63 }
 0x61e   :  { %3982 = vmatpush3.msra.mxu1 %v370_v56  ;;  %v4450_v1 = vpop.permute.xlu0 %4449 }
 0x61f   :  { %v4452_v2 = vunpack.i.h.bf16 %v4450_v1  ;;  %v4451_v4 = vunpack.i.l.bf16 %v4450_v1  ;;  %4256 = vmatprep.subr.msk.bf16.mxu1 %vm4905_vm5, %v4254_v0 }
 0x621   :  { %v4264_v5 = vpack.c.bf16 %v4452_v2, %v4451_v4  ;;  %v371_v4 = vld [vmem:[%s5435_s30 + $0x8] sm:$0xff] }
 0x622   :  { %v949_v7 = vpop.permute.xlu0 %948 }
 0x623   :  { %4266 = vmatprep.subr.msk.bf16.mxu0 %vm4905_vm5, %v4264_v5  ;;  %4009 = vmatprep.mubr.msk.f32.mxu0 %vm388_vm4, %v949_v7 }
 0x624   :  { %4269 = vmatpush3.bf16.xpose.msk.msra.mxu0 %vm4905_vm5, %v4264_v5 }
 0x626   :  { %v951_v9 = vpop.permute.xlu0 %950 }
 0x62b   :  { %4010 = vmatmul.mubr.msk.f32.vlgmr.msra.gmra.mrb[2].mxu0 %vm388_vm4, %v951_v9 }
 0x6f0   :  { %v3980_v10 = vpop.f32.mrb[4].mxu1 }
 0x6f1   :  { %v573_v12 = vpop.f32.mrb[5].mxu1 }
 0x6f2   :  { %3983 = vmatprep.mubr.msk.f32.mxu1 %vm388_vm4, %v573_v12 }
 0x6f3   :  { %3984 = vmatmul.mubr.msk.f32.vlgmr.msra.gmra.mrb[6].mxu1 %vm388_vm4, %v3980_v10 }
 0x6f4   :  { %4259 = vmatpush3.bf16.xpose.msk.msra.mxu1 %vm4905_vm5, %v4254_v0  ;;  %3990 = vmatprep.mubr.msk.f32.mxu1 %vm388_vm4, %v666_v15 }
 0x6fb   :  { %3991 = vmatmul.mubr.msk.f32.vlgmr.msra.gmra.mrb[8].mxu1 %vm388_vm4, %v668_v61 }
 0x6fe   :  { %v4011_v16 = vpop.f32.mrb[2].mxu0 }
 0x6ff   :  { %v1030_v17 = vpop.f32.mrb[3].mxu0  ;;  %v1036_v40 = vadd.f32 %v4011_v16, %v4928_v32 }
 0x700   :  { %v1031_v39 = vadd.f32 %v1030_v17, %v4930_v34 }
 0x701   :  { %v1042_v42 = vsel %vm472_vm12, %v1036_v40, -inf }
 0x702   :  { %v1039_v41 = vsel %vm472_vm12, %v1031_v39, -inf }
 0x7ce   :  { %v3992_v18 = vpop.f32.mrb[8].mxu1 }
 0x7cf   :  { %v753_v19 = vadd.f32 %v3992_v18, %v4928_v32  ;;  %v747_v21 = vpop.f32.mrb[9].mxu1 }
 0x7d0   :  { %v748_v22 = vadd.f32 %v747_v21, %v4930_v34 }
 0x7d1   :  { %v759_v24 = vsel %vm472_vm12, %v753_v19, -inf }
 0x7d2   :  { %760 = vmax.xlane.f32.xlu0 %v759_v24  ;;  %v756_v27 = vsel %vm472_vm12, %v748_v22, -inf }
 0x7d3   :  { %757 = vmax.xlane.f32.xlu1 %v756_v27 }
 0x85f   :  { %v761_v28 = vpop.xlane.xlu0 %760 }
 0x860   :  { %v763_v30 = vsub.f32 %v753_v19, %v761_v28  ;;  %v758_v31 = vpop.xlane.xlu1 %757 }
 0x861   :  { %v762_v26 = vsub.f32 %v748_v22, %v758_v31 }
 0x862   :  { %v766_v33 = vmul.f32 1.442695, %v763_v30 }
 0x863   :  { %v764_v3 = vmul.f32 1.442695, %v762_v26 }
 0x864   :  { %4525 = vpow2.f32 %v766_v33  ;;  %v372_v33 = vld [vmem:[%s5435_s30 + $0x10] sm:$0xff] }
 0x865   :  { %4527 = vpow2.f32 %v764_v3 }
 0x86e   :  { %v4526_v35 = vpop.eup %4525 }
 0x86f   :  { %v4528_v36 = vpop.eup %4527  ;;  %v771_v37 = vsel %vm472_vm12, %v4526_v35, 0.0 }
 0x870   :  { %772 = vadd.xlane.f32.xlu1 %v771_v37  ;;  %v768_v38 = vsel %vm472_vm12, %v4528_v36, 0.0 }
 0x871   :  { %769 = vadd.xlane.f32.xlu0 %v768_v38 }
 0x881   :  { %4459 = vrot.lane.b32.xlu1 %v4893_v14, %s5402_s6 }
 0x885   :  { %1231 = vrot.lane.b32.xlu1 %v4887_v13, %s5400_s11 }
 0x887   :  { %4454 = vrot.lane.b32.xlu0 %v4893_v14, %s5399_s3  ;;  %s5441_s3 = smov 64  }
 0x88b   :  { %1233 = vrot.lane.b32.xlu0 %v4885_v11, %s5400_s11  ;;  %s5440_s11 = smov 112  }
 0x8a9   :  { %1040 = vmax.xlane.f32.xlu1 %v1039_v41 }
 0x8aa   :  { %1043 = vmax.xlane.f32.xlu0 %v1042_v42 }
 0x8fd   :  { %v773_v43 = vpop.xlane.xlu1 %772 }
 0x8fe   :  { %4529 = vrcp.f32 %v773_v43  ;;  %v770_v13 = vpop.xlane.xlu0 %769 }
 0x8ff   :  { %4531 = vrcp.f32 %v770_v13 }
 0x901   :  { %v4460_v44 = vpop.permute.xlu1 %4459 }
 0x902   :  { %v4462_v45 = vunpack.i.h.bf16 %v4460_v44  ;;  %v4461_v46 = vunpack.i.l.bf16 %v4460_v44  ;;  %v4455_v47 = vpop.permute.xlu0 %4454 }
 0x903   :  { %v4457_v48 = vunpack.i.h.bf16 %v4455_v47  ;;  %v4456_v11 = vunpack.i.l.bf16 %v4455_v47 }
 0x904   :  { %v4274_v49 = vpack.c.bf16 %v4462_v45, %v4461_v46 }
 0x905   :  { %v4260_v50 = vpack.c.bf16 %v4457_v48, %v4456_v11  ;;  %v1232_v51 = vpop.permute.xlu1 %1231 }
 0x906   :  { %4276 = vmatprep.subr.msk.bf16.mxu0 %vm4905_vm5, %v4274_v49  ;;  %4028 = vmatprep.mubr.msk.f32.mxu0 %vm388_vm4, %v1232_v51  ;;  %v1234_v56 = vpop.permute.xlu0 %1233 }
 0x907   :  { %4261 = vmatprep.subr.bf16.mxu1 %v4260_v50  ;;  %4279 = vmatpush3.bf16.xpose.msk.msra.mxu0 %vm4905_vm5, %v4274_v49 }
 0x908   :  { %v4530_v52 = vpop.eup %4529  ;;  %4263 = vmatpush3.bf16.msra.mxu1 %v4260_v50 }
 0x909   :  { %v4532_v53 = vpop.eup %4531  ;;  %v777_v55 = vmul.f32 %v4530_v52, %v4526_v35  ;;  %4000 = vmatprep.subr.mxu1 %v371_v4 }
 0x90a   :  { %v776_v54 = vmul.f32 %v4532_v53, %v4528_v36 }
 0x90c   :  { %3997 = vmatprep.mubr.msk.f32.mxu1 %vm472_vm12, %v776_v54 }
 0x90d   :  { %3998 = vmatmul.mubr.msk.f32.vlgmr.msra.gmra.mrb[10].mxu1 %vm472_vm12, %v777_v55 }
 0x90e   :  { %4029 = vmatmul.mubr.msk.f32.vlgmr.msra.gmra.mrb[4].mxu0 %vm388_vm4, %v1234_v56  ;;  %4001 = vmatpush3.msra.mxu1 %v371_v4 }
 0x936   :  { %v1041_v57 = vpop.xlane.xlu1 %1040 }
 0x937   :  { %v1045_v58 = vsub.f32 %v1031_v39, %v1041_v57  ;;  %v1044_v59 = vpop.xlane.xlu0 %1043 }
 0x938   :  { %v1046_v60 = vsub.f32 %v1036_v40, %v1044_v59 }
 0x939   :  { %v1047_v61 = vmul.f32 1.442695, %v1045_v58 }
 0x93a   :  { %v1049_v62 = vmul.f32 1.442695, %v1046_v60 }
 0x93b   :  { %4533 = vpow2.f32 %v1047_v61 }
 0x93c   :  { %4535 = vpow2.f32 %v1049_v62 }
 0x945   :  { %v4534_v63 = vpop.eup %4533 }
 0x946   :  { %v4536_v0 = vpop.eup %4535  ;;  %v1051_v1 = vsel %vm472_vm12, %v4534_v63, 0.0 }
 0x947   :  { %1052 = vadd.xlane.f32.xlu0 %v1051_v1  ;;  %v1054_v2 = vsel %vm472_vm12, %v4536_v0, 0.0 }
 0x948   :  { %1055 = vadd.xlane.f32.xlu1 %v1054_v2 }
 0x95d   :  { %4464 = vrot.lane.b32.xlu0 %v4893_v14, %s5397_s9  ;;  %s5436_s9 = sld [smem:[#allocation18_spill]] }
 0x963   :  { %v3643_v56 = vld [vmem:[%s5436_s9] ss:$0 sm:$0xff] }
 0x9d4   :  { %v1053_v5 = vpop.xlane.xlu0 %1052 }
 0x9d5   :  { %4537 = vrcp.f32 %v1053_v5  ;;  %v1056_v7 = vpop.xlane.xlu1 %1055 }
 0x9d6   :  { %4539 = vrcp.f32 %v1056_v7 }
 0x9d8   :  { %v4465_v9 = vpop.permute.xlu0 %4464 }
 0x9d9   :  { %v4467_v10 = vunpack.i.h.bf16 %v4465_v9  ;;  %v4466_v12 = vunpack.i.l.bf16 %v4465_v9 }
 0x9db   :  { %v4270_v15 = vpack.c.bf16 %v4467_v10, %v4466_v12 }
 0x9dd   :  { %4271 = vmatprep.subr.bf16.mxu1 %v4270_v15 }
 0x9df   :  { %v4538_v16 = vpop.eup %4537 }
 0x9e0   :  { %v3999_v17 = vpop.f32.mrb[10].mxu1  ;;  %v4540_v21 = vpop.eup %4539  ;;  %v1059_v24 = vmul.f32 %v4538_v16, %v4534_v63  ;;  %v1561_v16 = vld [vmem:[%s5375_s15 + $0x8] sm:$0xff] }
 0x9e1   :  { %v856_v18 = vpop.f32.mrb[11].mxu1  ;;  %v4030_v19 = vpop.f32.mrb[4].mxu0  ;;  %v1060_v28 = vmul.f32 %v4540_v21, %v4536_v0 }
 0x9e2   :  { %4002 = vmatprep.mubr.msk.f32.mxu1 %vm388_vm4, %v856_v18  ;;  %v1313_v22 = vpop.f32.mrb[5].mxu0  ;;  %v1319_v30 = vadd.f32 %v4030_v19, %v4928_v32  ;;  %v1562_v18 = vld [vmem:[%s5375_s15 + $0x10] sm:$0xff]  ;;  %v1563_v19 = vld [vmem:[%s5375_s15 + $0x18] sm:$0xff] }
 0x9e3   :  { %v1314_v27 = vadd.f32 %v1313_v22, %v4930_v34  ;;  %4003 = vmatmul.mubr.msk.f32.vlgmr.msra.gmra.mrb[6].mxu1 %vm388_vm4, %v3999_v17  ;;  %v4288_v21 = vpack.c.bf16 %v1563_v19, %v1562_v18 }
 0x9e4   :  { %4273 = vmatpush3.bf16.msra.mxu1 %v4270_v15  ;;  %4016 = vmatprep.mubr.msk.f32.mxu1 %vm472_vm12, %v1059_v24  ;;  %v1325_v26 = vsel %vm472_vm12, %v1319_v30, -inf }
 0x9e5   :  { %v1322_v31 = vsel %vm472_vm12, %v1314_v27, -inf  ;;  %4019 = vmatprep.subr.mxu1 %v372_v33 }
 0x9e6   :  { %1323 = vmax.xlane.f32.xlu1 %v1322_v31 }
 0x9e7   :  { %4017 = vmatmul.mubr.msk.f32.vlgmr.msra.gmra.mrb[12].mxu1 %vm472_vm12, %v1060_v28 }
 0x9e8   :  { %4020 = vmatpush3.msra.mxu1 %v372_v33  ;;  %v3676_v33 = vld [vmem:[%s5373_s13] ss:$0 sm:$0xff] }
 0x9ea   :  { %1326 = vmax.xlane.f32.xlu1 %v1325_v26 }
 0xa73   :  { %v1324_v3 = vpop.xlane.xlu1 %1323 }
 0xa74   :  { %v1328_v35 = vsub.f32 %v1314_v27, %v1324_v3 }
 0xa76   :  { %v1330_v36 = vmul.f32 1.442695, %v1328_v35  ;;  %v3677_v35 = vld [vmem:[%s5374_s14] ss:$0 sm:$0xff] }
 0xa77   :  { %v1327_v37 = vpop.xlane.xlu1 %1326 }
 0xa78   :  { %4541 = vpow2.f32 %v1330_v36  ;;  %v1329_v38 = vsub.f32 %v1319_v30, %v1327_v37 }
 0xa7a   :  { %v1332_v39 = vmul.f32 1.442695, %v1329_v38 }
 0xa7c   :  { %4543 = vpow2.f32 %v1332_v39 }
 0xa82   :  { %v4542_v40 = vpop.eup %4541 }
 0xa83   :  { %v1334_v41 = vsel %vm472_vm12, %v4542_v40, 0.0 }
 0xa84   :  { %1335 = vadd.xlane.f32.xlu1 %v1334_v41 }
 0xa86   :  { %v4544_v42 = vpop.eup %4543 }
 0xa87   :  { %v1337_v43 = vsel %vm472_vm12, %v4544_v42, 0.0 }
 0xa88   :  { %1338 = vadd.xlane.f32.xlu1 %v1337_v43  ;;  %v1671_v43 = vld [vmem:[%s5377_s17 + $0x8] sm:$0xff] }
 0xa99   :  { %4469 = vrot.lane.b32.xlu1 %v4893_v14, %s5398_s0  ;;  %v373_v14 = vld [vmem:[%s5435_s30 + $0x18] sm:$0xff]  ;;  %s5445_s0 = smov 48  }
 0xaba   :  { %v4018_v13 = vpop.f32.mrb[12].mxu1 }
 0xabb   :  { %v1139_v44 = vpop.f32.mrb[13].mxu1 }
 0xabc   :  { %4021 = vmatprep.mubr.msk.f32.mxu1 %vm388_vm4, %v1139_v44  ;;  %v1672_v44 = vld [vmem:[%s5377_s17 + $0x10] sm:$0xff] }
 0xabd   :  { %4022 = vmatmul.mubr.msk.f32.vlgmr.msra.gmra.mrb[6].mxu1 %vm388_vm4, %v4018_v13 }
 0xb11   :  { %v1336_v45 = vpop.xlane.xlu1 %1335 }
 0xb12   :  { %4545 = vrcp.f32 %v1336_v45  ;;  %v1673_v45 = vld [vmem:[%s5377_s17 + $0x18] sm:$0xff] }
 0xb15   :  { %v1339_v46 = vpop.xlane.xlu1 %1338 }
 0xb16   :  { %4547 = vrcp.f32 %v1339_v46  ;;  %v4296_v46 = vpack.c.bf16 %v1673_v45, %v1672_v44 }
 0xb19   :  { %v4470_v47 = vpop.permute.xlu1 %4469 }
 0xb1a   :  { %v4472_v48 = vunpack.i.h.bf16 %v4470_v47  ;;  %v4471_v11 = vunpack.i.l.bf16 %v4470_v47  ;;  %v1674_v47 = vld [vmem:[%s5377_s17 + $0x20] sm:$0xff] }
 0xb1c   :  { %v4546_v49 = vpop.eup %4545  ;;  %v4280_v50 = vpack.c.bf16 %v4472_v48, %v4471_v11  ;;  %v1675_v48 = vld [vmem:[%s5377_s17 + $0x28] sm:$0xff] }
 0xb1d   :  { %v1342_v51 = vmul.f32 %v4546_v49, %v4542_v40  ;;  %v4300_v11 = vpack.c.bf16 %v1675_v48, %v1674_v47  ;;  %v1676_v49 = vld [vmem:[%s5377_s17 + $0x30] sm:$0xff] }
 0xb1e   :  { %4281 = vmatprep.subr.bf16.mxu1 %v4280_v50 }
 0xb1f   :  { %4283 = vmatpush3.bf16.msra.mxu1 %v4280_v50  ;;  %4035 = vmatprep.mubr.msk.f32.mxu1 %vm472_vm12, %v1342_v51  ;;  %v1677_v50 = vld [vmem:[%s5377_s17 + $0x38] sm:$0xff] }
 0xb20   :  { %v4548_v52 = vpop.eup %4547  ;;  %4038 = vmatprep.subr.mxu1 %v373_v14  ;;  %v4304_v51 = vpack.c.bf16 %v1677_v50, %v1676_v49  ;;  %v3684_v49 = vld [vmem:[%s5379_s19] ss:$0 sm:$0xff] }
 0xb21   :  { %v1343_v53 = vmul.f32 %v4548_v52, %v4544_v42  ;;  %v1670_v42 = vld [vmem:[%s5377_s17] sm:$0xff] }
 0xb22   :  { %v4292_v13 = vpack.c.bf16 %v1671_v43, %v1670_v42  ;;  %v3689_v42 = vld [vmem:[%s5426_s26 + $0x38] sm:$0xff] }
 0xb23   :  { %4036 = vmatmul.mubr.msk.f32.vlgmr.msra.gmra.mrb[14].mxu1 %vm472_vm12, %v1343_v53 }
 0xb24   :  { %4039 = vmatpush3.msra.mxu1 %v373_v14  ;;  %v3678_v14 = vld [vmem:[%s5376_s16] ss:$0 sm:$0xff] }
 0xb25   :  { %4293 = vmatprep.subr.bf16.mxu1 %v4292_v13 }
 0xbf6   :  { %v4037_v54 = vpop.f32.mrb[14].mxu1 }
 0xbf7   :  { %v1422_v55 = vpop.f32.mrb[15].mxu1 }
 0xbf8   :  { %4040 = vmatprep.mubr.msk.f32.mxu1 %vm388_vm4, %v1422_v55 }
 0xbf9   :  { %4041 = vmatmul.mubr.msk.f32.vlgmr.msra.gmra.mrb[6].mxu1 %vm388_vm4, %v4037_v54 }
 0xbfa   :  { %4295 = vmatpush3.bf16.msra.mxu1 %v4292_v13 }
 0xbfb   :  { %4297 = vmatprep.subr.bf16.mxu1 %v4296_v46 }
 0xbfe   :  { %4299 = vmatpush3.bf16.msra.mxu1 %v4296_v46 }
 0xbff   :  { %4301 = vmatprep.subr.bf16.mxu1 %v4300_v11 }
 0xc02   :  { %4303 = vmatpush3.bf16.msra.mxu1 %v4300_v11 }
 0xc03   :  { %4305 = vmatprep.subr.bf16.mxu1 %v4304_v51 }
 0xc06   :  { %4307 = vmatpush3.bf16.msra.mxu1 %v4304_v51  ;;  %v3685_v51 = vld [vmem:[%s5380_s20] ss:$0 sm:$0xff] }
 0xccc   :  { %v4042_v57 = vpop.f32.mrb[6].mxu1 }
 0xccd   :  { %v4391_v58 = vadd.f32 %v4042_v57, %v3643_v56  ;;  %v1503_v59 = vpop.f32.mrb[7].mxu1 }
 0xcce   :  { %v4392_v60 = vadd.f32 %v3643_v56, %v1503_v59 }
 0xccf   :  { %v1515_v61 = vadd.f32 %v4391_v58, %v4878_v8 }
 0xcd0   :  { %v1514_v62 = vadd.f32 %v4392_v60, %v4874_v6  ;;  %v1560_v6 = vld [vmem:[%s5375_s15] sm:$0xff] }
 0xcd1   :  { %v1521_v63 = vsel %vm207_vm3, %v1515_v61, 0.0  ;;  %v4284_v17 = vpack.c.bf16 %v1561_v16, %v1560_v6 }
 0xcd2   :  { %1522 = vadd.xlane.f32.xlu1 %v1521_v63  ;;  %v1518_v0 = vsel %vm207_vm3, %v1514_v62, 0.0 }
 0xcd3   :  { %1519 = vadd.xlane.f32.xlu0 %v1518_v0  ;;  %4285 = vmatprep.subr.bf16.mxu0 %v4284_v17 }
 0xcd4   :  { %4287 = vmatpush3.bf16.msra.mxu0 %v4284_v17 }
 0xcd5   :  { %4289 = vmatprep.subr.bf16.mxu0 %v4288_v21 }
 0xcd8   :  { %4291 = vmatpush3.bf16.msra.mxu0 %v4288_v21 }
 0xd5f   :  { %v1523_v1 = vpop.xlane.xlu1 %1522 }
 0xd60   :  { %v1525_v2 = vmul.f32 0.03125, %v1523_v1  ;;  %v1520_v4 = vpop.xlane.xlu0 %1519 }
 0xd61   :  { %v1524_v5 = vmul.f32 0.03125, %v1520_v4 }
 0xd62   :  { %v1527_v7 = vsub.f32 %v1515_v61, %v1525_v2 }
 0xd63   :  { %v1526_v9 = vsub.f32 %v1514_v62, %v1524_v5 }
 0xd64   :  { %v1529_v15 = vmul.f32 %v1527_v7, %v1527_v7 }
 0xd65   :  { %v1528_v10 = vmul.f32 %v1526_v9, %v1526_v9 }
 0xd66   :  { %v1533_v8 = vsel %vm207_vm3, %v1529_v15, 0.0 }
 0xd67   :  { %v1530_v12 = vsel %vm207_vm3, %v1528_v10, 0.0 }
 0xd68   :  { %1531 = vadd.xlane.f32.xlu0 %v1530_v12 }
 0xd6c   :  { %1534 = vadd.xlane.f32.xlu0 %v1533_v8  ;;  %v3681_v8 = vld [vmem:[%s5378_s18] ss:$0 sm:$0xff] }
 0xdf5   :  { %v1532_v22 = vpop.xlane.xlu0 %1531 }
 0xdf6   :  { %v1536_v24 = vmul.f32 0.03125, %v1532_v22 }
 0xdf8   :  { %v1538_v27 = vadd.f32 1e-12, %v1536_v24 }
 0xdf9   :  { %v1535_v28 = vpop.xlane.xlu0 %1534 }
 0xdfa   :  { %4549 = vrsqrt.f32 %v1538_v27  ;;  %v1537_v30 = vmul.f32 0.03125, %v1535_v28 }
 0xdfc   :  { %v1539_v31 = vadd.f32 1e-12, %v1537_v30 }
 0xdfe   :  { %4551 = vrsqrt.f32 %v1539_v31 }
 0xe04   :  { %v4550_v26 = vpop.eup %4549 }
 0xe05   :  { %v1542_v3 = vmul.f32 %v4550_v26, %v1526_v9 }
 0xe07   :  { %v1550_v36 = vmul.f32 %v3676_v33, %v1542_v3 }
 0xe08   :  { %v4552_v37 = vpop.eup %4551 }
 0xe09   :  { %v1543_v38 = vmul.f32 %v4552_v37, %v1527_v7  ;;  %v1558_v39 = vadd.f32 %v3677_v35, %v1550_v36 }
 0xe0b   :  { %v1551_v40 = vmul.f32 %v3676_v33, %v1543_v38  ;;  %4051 = vmatprep.mubr.msk.f32.mxu0 %vm207_vm3, %v1558_v39  ;;  %v3686_v38 = vld [vmem:[%s5426_s26 + $0x20] sm:$0xff] }
 0xe0d   :  { %v1559_v41 = vadd.f32 %v3677_v35, %v1551_v40 }
 0xe0f   :  { %4052 = vmatmul.mubr.msk.f32.vlgmr.msra.gmra.mrb[6].mxu0 %vm207_vm3, %v1559_v41 }
 0xee2   :  { %v4053_v52 = vpop.f32.mrb[6].mxu0 }
 0xee3   :  { %v1649_v53 = vadd.f32 %v4053_v52, %v3678_v14  ;;  %v1643_v54 = vpop.f32.mrb[7].mxu0 }
 0xee4   :  { %v1644_v55 = vadd.f32 %v3678_v14, %v1643_v54 }
 0xee5   :  { %v1655_v56 = vmul.f32 0.044715, %v1649_v53  ;;  %v1653_v10 = vmul.f32 0.5, %v1649_v53 }
 0xee6   :  { %v1654_v57 = vmul.f32 0.044715, %v1644_v55  ;;  %v1652_v7 = vmul.f32 0.5, %v1644_v55 }
 0xee7   :  { %v1657_v58 = vmul.f32 %v1655_v56, %v1649_v53 }
 0xee8   :  { %v1656_v59 = vmul.f32 %v1654_v57, %v1644_v55  ;;  %v3691_v57 = vld [vmem:[%s5429_s7 + $0x1] ss:$0 sm:$0xff]  ;;  %s5438_s7 = smov 120  }
 0xee9   :  { %v1659_v60 = vmul.f32 %v1657_v58, %v1649_v53 }
 0xeea   :  { %v1658_v61 = vmul.f32 %v1656_v59, %v1644_v55 }
 0xeeb   :  { %v1661_v62 = vadd.f32 %v1659_v60, %v1649_v53 }
 0xeec   :  { %v1660_v63 = vadd.f32 %v1658_v61, %v1644_v55 }
 0xeed   :  { %v1663_v0 = vmul.f32 0.7978846, %v1661_v62 }
 0xeee   :  { %v1662_v1 = vmul.f32 0.7978846, %v1660_v63 }
 0xeef   :  { %4553 = vtanh.f32 %v1663_v0 }
 0xef0   :  { %4555 = vtanh.f32 %v1662_v1 }
 0xef9   :  { %v4554_v2 = vpop.eup %4553 }
 0xefa   :  { %v4556_v4 = vpop.eup %4555  ;;  %v1667_v5 = vadd.f32 1.0, %v4554_v2 }
 0xefb   :  { %v1666_v9 = vadd.f32 1.0, %v4556_v4 }
 0xefc   :  { %v1669_v15 = vmul.f32 %v1667_v5, %v1653_v10 }
 0xefd   :  { %v1668_v12 = vmul.f32 %v1666_v9, %v1652_v7 }
 0xeff   :  { %4070 = vmatprep.mubr.msk.f32.mxu1 %vm1685_vm13, %v1668_v12 }
 0xf00   :  { %4071 = vmatmul.mubr.msk.f32.vlgmr.msra.gmra.mrb[16].mxu1 %vm1685_vm13, %v1669_v15 }
 0xfd3   :  { %v4072_v6 = vpop.f32.mrb[16].mxu1 }
 0xfd4   :  { %v1758_v16 = vpop.f32.mrb[17].mxu1  ;;  %v1764_v17 = vadd.f32 %v4072_v6, %v3681_v8 }
 0xfd5   :  { %v1759_v18 = vadd.f32 %v3681_v8, %v1758_v16 }
 0xfd6   :  { %v1768_v22 = vadd.f32 %v1764_v17, %v1559_v41  ;;  %v3688_v41 = vld [vmem:[%s5426_s26 + $0x30] sm:$0xff] }
 0xfd7   :  { %v1767_v19 = vadd.f32 %v1759_v18, %v1558_v39  ;;  %v3687_v39 = vld [vmem:[%s5426_s26 + $0x28] sm:$0xff]  ;;  %v4312_v43 = vpack.c.bf16 %v3689_v42, %v3688_v41 }
 0xfd8   :  { %v1774_v24 = vsel %vm207_vm3, %v1768_v22, 0.0  ;;  %v4308_v40 = vpack.c.bf16 %v3687_v39, %v3686_v38 }
 0xfd9   :  { %v1771_v21 = vsel %vm207_vm3, %v1767_v19, 0.0 }
 0xfda   :  { %1772 = vadd.xlane.f32.xlu0 %v1771_v21  ;;  %4309 = vmatprep.subr.bf16.mxu0 %v4308_v40 }
 0xfdb   :  { %4311 = vmatpush3.bf16.msra.mxu0 %v4308_v40 }
 0xfdc   :  { %4313 = vmatprep.subr.bf16.mxu0 %v4312_v43 }
 0xfde   :  { %1775 = vadd.xlane.f32.xlu0 %v1774_v24 }
 0xfdf   :  { %4315 = vmatpush3.bf16.msra.mxu0 %v4312_v43 }
0x1067   :  { %v1773_v27 = vpop.xlane.xlu0 %1772 }
0x1068   :  { %v1777_v28 = vmul.f32 0.03125, %v1773_v27 }
0x106a   :  { %v1779_v30 = vsub.f32 %v1767_v19, %v1777_v28 }
0x106b   :  { %v1776_v31 = vpop.xlane.xlu0 %1775 }
0x106c   :  { %v1778_v26 = vmul.f32 0.03125, %v1776_v31  ;;  %v1781_v33 = vmul.f32 %v1779_v30, %v1779_v30 }
0x106e   :  { %v1780_v3 = vsub.f32 %v1768_v22, %v1778_v26  ;;  %v1783_v35 = vsel %vm207_vm3, %v1781_v33, 0.0 }
0x106f   :  { %1784 = vadd.xlane.f32.xlu0 %v1783_v35 }
0x1070   :  { %v1782_v36 = vmul.f32 %v1780_v3, %v1780_v3 }
0x1072   :  { %v1786_v37 = vsel %vm207_vm3, %v1782_v36, 0.0 }
0x1073   :  { %1787 = vadd.xlane.f32.xlu1 %v1786_v37 }
0x10fc   :  { %v1785_v13 = vpop.xlane.xlu0 %1784 }
0x10fd   :  { %v1789_v44 = vmul.f32 0.03125, %v1785_v13 }
0x10ff   :  { %v1791_v45 = vadd.f32 1e-12, %v1789_v44 }
0x1100   :  { %v1788_v46 = vpop.xlane.xlu1 %1787 }
0x1101   :  { %4557 = vrsqrt.f32 %v1791_v45  ;;  %v1790_v47 = vmul.f32 0.03125, %v1788_v46 }
0x1103   :  { %v1792_v48 = vadd.f32 1e-12, %v1790_v47 }
0x1105   :  { %4559 = vrsqrt.f32 %v1792_v48 }
0x110b   :  { %v4558_v11 = vpop.eup %4557 }
0x110c   :  { %v1795_v50 = vmul.f32 %v4558_v11, %v1779_v30 }
0x110e   :  { %v1803_v14 = vmul.f32 %v3684_v49, %v1795_v50 }
0x110f   :  { %v4560_v52 = vpop.eup %4559 }
0x1110   :  { %v1796_v53 = vmul.f32 %v4560_v52, %v1780_v3  ;;  %v5111_v54 = vadd.f32 %v3685_v51, %v1803_v14 }
0x1112   :  { %v1804_v55 = vmul.f32 %v3684_v49, %v1796_v53  ;;  %4081 = vmatprep.mubr.msk.f32.mxu0 %vm207_vm3, %v5111_v54 }
0x1114   :  { %v5115_v56 = vadd.f32 %v3685_v51, %v1804_v55 }
0x1116   :  { %4082 = vmatmul.mubr.msk.f32.vlgmr.msra.gmra.mrb[8].mxu0 %vm207_vm3, %v5115_v56 }
0x11e9   :  { %v4083_v58 = vpop.f32.mrb[8].mxu0 }
0x11ea   :  { %v5122_v59 = vadd.f32 %v4083_v58, %v3691_v57  ;;  %v1898_v60 = vpop.f32.mrb[9].mxu0 }
0x11eb   :  { %v5124_v61 = vadd.f32 %v3691_v57, %v1898_v60 }
0x11ed   :  { %4088 = vmatprep.mubr.msk.f32.mxu0 %vm388_vm4, %v5124_v61  ;;  %v5130_v62 = vpack.i.bf16 %v5122_v59, %v5124_v61 }
0x11ef   :  { %4479 = vrot.lane.b32.xlu1 %v5130_v62, %s4633_s1  ;;  %4474 = vrot.lane.b32.xlu0 %v5130_v62, %s5437_s5  ;;  %s5439_s1 = smov 80  }
0x11f3   :  { %2202 = vrot.lane.b32.xlu1 %v5124_v61, %s5438_s7  ;;  %2204 = vrot.lane.b32.xlu0 %v5122_v59, %s5438_s7 }
0x1261   :  { %v4480_v63 = vpop.permute.xlu1 %4479  ;;  %v4475_v0 = vpop.permute.xlu0 %4474 }
0x1262   :  { %v4482_v1 = vunpack.i.h.bf16 %v4480_v63  ;;  %v4481_v2 = vunpack.i.l.bf16 %v4480_v63  ;;  %v4477_v4 = vunpack.i.h.bf16 %v4475_v0  ;;  %v4476_v5 = vunpack.i.l.bf16 %v4475_v0 }
0x1264   :  { %v4316_v7 = vpack.c.bf16 %v4477_v4, %v4476_v5  ;;  %v4326_v9 = vpack.c.bf16 %v4482_v1, %v4481_v2  ;;  %v3694_v5 = vld [vmem:[%s5435_s30 + $0x20] sm:$0xff] }
0x1265   :  { %v2203_v10 = vpop.permute.xlu1 %2202  ;;  %v2205_v12 = vpop.permute.xlu0 %2204 }
0x1266   :  { %4318 = vmatprep.subr.msk.bf16.mxu0 %vm4905_vm5, %v4316_v7 }
0x1267   :  { %4321 = vmatpush3.bf16.xpose.msk.msra.mxu0 %vm4905_vm5, %v4316_v7 }
0x1268   :  { %4328 = vmatprep.subr.msk.bf16.mxu0 %vm4905_vm5, %v4326_v9 }
0x126e   :  { %4089 = vmatmul.mubr.msk.f32.vlgmr.msra.gmra.mrb[10].mxu0 %vm388_vm4, %v5122_v59 }
0x126f   :  { %4331 = vmatpush3.bf16.xpose.msk.msra.mxu0 %vm4905_vm5, %v4326_v9  ;;  %4107 = vmatprep.mubr.msk.f32.mxu0 %vm388_vm4, %v2203_v10 }
0x1276   :  { %4108 = vmatmul.mubr.msk.f32.vlgmr.msra.gmra.mrb[12].mxu0 %vm388_vm4, %v2205_v12 }
0x1341   :  { %v4090_v15 = vpop.f32.mrb[10].mxu0 }
0x1342   :  { %v2007_v8 = vadd.f32 %v4090_v15, %v4928_v32  ;;  %v2001_v6 = vpop.f32.mrb[11].mxu0 }
0x1343   :  { %v2002_v16 = vadd.f32 %v2001_v6, %v4930_v34 }
0x1344   :  { %v2013_v17 = vsel %vm472_vm12, %v2007_v8, -inf }
0x1345   :  { %2014 = vmax.xlane.f32.xlu0 %v2013_v17  ;;  %v2010_v18 = vsel %vm472_vm12, %v2002_v16, -inf }
0x1346   :  { %2011 = vmax.xlane.f32.xlu1 %v2010_v18 }
0x1349   :  { %v4109_v19 = vpop.f32.mrb[12].mxu0 }
0x134a   :  { %v2284_v21 = vpop.f32.mrb[13].mxu0  ;;  %v2290_v37 = vadd.f32 %v4109_v19, %v4928_v32 }
0x134b   :  { %v2285_v36 = vadd.f32 %v2284_v21, %v4930_v34 }
0x134c   :  { %v2296_v39 = vsel %vm472_vm12, %v2290_v37, -inf }
0x134d   :  { %v2293_v38 = vsel %vm472_vm12, %v2285_v36, -inf }
0x13d2   :  { %v2015_v22 = vpop.xlane.xlu0 %2014 }
0x13d3   :  { %v2017_v24 = vsub.f32 %v2007_v8, %v2015_v22  ;;  %v2012_v27 = vpop.xlane.xlu1 %2011 }
0x13d4   :  { %v2016_v28 = vsub.f32 %v2002_v16, %v2012_v27 }
0x13d5   :  { %v2020_v30 = vmul.f32 1.442695, %v2017_v24 }
0x13d6   :  { %v2018_v31 = vmul.f32 1.442695, %v2016_v28 }
0x13d7   :  { %4561 = vpow2.f32 %v2020_v30 }
0x13d8   :  { %4563 = vpow2.f32 %v2018_v31 }
0x13e1   :  { %v4562_v26 = vpop.eup %4561 }
0x13e2   :  { %v4564_v33 = vpop.eup %4563  ;;  %v2025_v3 = vsel %vm472_vm12, %v4562_v26, 0.0 }
0x13e3   :  { %2026 = vadd.xlane.f32.xlu1 %v2025_v3  ;;  %v2022_v35 = vsel %vm472_vm12, %v4564_v33, 0.0 }
0x13e4   :  { %2023 = vadd.xlane.f32.xlu0 %v2022_v35  ;;  %v3695_v35 = vld [vmem:[%s5435_s30 + $0x28] sm:$0xff] }
0x13f4   :  { %4489 = vrot.lane.b32.xlu1 %v5130_v62, %s5439_s1  ;;  %s5446_s1 = smov 40  }
0x13f8   :  { %2485 = vrot.lane.b32.xlu1 %v5124_v61, %s5440_s11 }
0x13fa   :  { %4484 = vrot.lane.b32.xlu0 %v5130_v62, %s5441_s3 }
0x13fe   :  { %2487 = vrot.lane.b32.xlu0 %v5122_v59, %s5440_s11 }
0x141c   :  { %2294 = vmax.xlane.f32.xlu1 %v2293_v38 }
0x141d   :  { %2297 = vmax.xlane.f32.xlu0 %v2296_v39 }
0x1470   :  { %v2027_v40 = vpop.xlane.xlu1 %2026 }
0x1471   :  { %4565 = vrcp.f32 %v2027_v40  ;;  %v2024_v41 = vpop.xlane.xlu0 %2023 }
0x1472   :  { %4567 = vrcp.f32 %v2024_v41 }
0x1474   :  { %v4490_v42 = vpop.permute.xlu1 %4489 }
0x1475   :  { %v4492_v43 = vunpack.i.h.bf16 %v4490_v42  ;;  %v4491_v13 = vunpack.i.l.bf16 %v4490_v42  ;;  %v4485_v44 = vpop.permute.xlu0 %4484 }
0x1476   :  { %v4487_v45 = vunpack.i.h.bf16 %v4485_v44  ;;  %v4486_v46 = vunpack.i.l.bf16 %v4485_v44 }
0x1477   :  { %v4336_v47 = vpack.c.bf16 %v4492_v43, %v4491_v13 }
0x1478   :  { %v4322_v48 = vpack.c.bf16 %v4487_v45, %v4486_v46  ;;  %v2486_v11 = vpop.permute.xlu1 %2485 }
0x1479   :  { %4338 = vmatprep.subr.msk.bf16.mxu0 %vm4905_vm5, %v4336_v47  ;;  %4126 = vmatprep.mubr.msk.f32.mxu0 %vm388_vm4, %v2486_v11  ;;  %v2488_v52 = vpop.permute.xlu0 %2487 }
0x147a   :  { %4323 = vmatprep.subr.bf16.mxu1 %v4322_v48  ;;  %4341 = vmatpush3.bf16.xpose.msk.msra.mxu0 %vm4905_vm5, %v4336_v47 }
0x147b   :  { %v4566_v49 = vpop.eup %4565  ;;  %4325 = vmatpush3.bf16.msra.mxu1 %v4322_v48 }
0x147c   :  { %v4568_v50 = vpop.eup %4567  ;;  %v2031_v14 = vmul.f32 %v4566_v49, %v4562_v26  ;;  %4098 = vmatprep.subr.mxu1 %v3694_v5 }
0x147d   :  { %v2030_v51 = vmul.f32 %v4568_v50, %v4564_v33 }
0x147f   :  { %4095 = vmatprep.mubr.msk.f32.mxu1 %vm472_vm12, %v2030_v51 }
0x1480   :  { %4096 = vmatmul.mubr.msk.f32.vlgmr.msra.gmra.mrb[18].mxu1 %vm472_vm12, %v2031_v14 }
0x1481   :  { %4127 = vmatmul.mubr.msk.f32.vlgmr.msra.gmra.mrb[14].mxu0 %vm388_vm4, %v2488_v52  ;;  %4099 = vmatpush3.msra.mxu1 %v3694_v5 }
0x14a9   :  { %v2295_v53 = vpop.xlane.xlu1 %2294 }
0x14aa   :  { %v2299_v55 = vsub.f32 %v2285_v36, %v2295_v53  ;;  %v2298_v57 = vpop.xlane.xlu0 %2297 }
0x14ab   :  { %v2300_v58 = vsub.f32 %v2290_v37, %v2298_v57 }
0x14ac   :  { %v2301_v60 = vmul.f32 1.442695, %v2299_v55 }
0x14ad   :  { %v2303_v63 = vmul.f32 1.442695, %v2300_v58 }
0x14ae   :  { %4569 = vpow2.f32 %v2301_v60 }
0x14af   :  { %4571 = vpow2.f32 %v2303_v63 }
0x14b8   :  { %v4570_v0 = vpop.eup %4569 }
0x14b9   :  { %v4572_v1 = vpop.eup %4571  ;;  %v2305_v2 = vsel %vm472_vm12, %v4570_v0, 0.0 }
0x14ba   :  { %2306 = vadd.xlane.f32.xlu0 %v2305_v2  ;;  %v2308_v4 = vsel %vm472_vm12, %v4572_v1, 0.0 }
0x14bb   :  { %2309 = vadd.xlane.f32.xlu1 %v2308_v4 }
0x14cc   :  { %4499 = vrot.lane.b32.xlu1 %v5130_v62, %s5442_s12 }
0x14d0   :  { %2768 = vrot.lane.b32.xlu1 %v5124_v61, %s5443_s4  ;;  %4494 = vrot.lane.b32.xlu0 %v5130_v62, %s5444_s8 }
0x14d4   :  { %2770 = vrot.lane.b32.xlu0 %v5122_v59, %s5443_s4 }
0x1547   :  { %v2307_v7 = vpop.xlane.xlu0 %2306 }
0x1548   :  { %4573 = vrcp.f32 %v2307_v7  ;;  %v2310_v9 = vpop.xlane.xlu1 %2309 }
0x1549   :  { %4575 = vrcp.f32 %v2310_v9 }
0x154b   :  { %v4495_v10 = vpop.permute.xlu0 %4494 }
0x154c   :  { %v4497_v12 = vunpack.i.h.bf16 %v4495_v10  ;;  %v4496_v15 = vunpack.i.l.bf16 %v4495_v10  ;;  %v4500_v8 = vpop.permute.xlu1 %4499 }
0x154d   :  { %v4502_v6 = vunpack.i.h.bf16 %v4500_v8  ;;  %v4501_v16 = vunpack.i.l.bf16 %v4500_v8  ;;  %v3696_v8 = vld [vmem:[%s5435_s30 + $0x30] sm:$0xff] }
0x154e   :  { %v4332_v17 = vpack.c.bf16 %v4497_v12, %v4496_v15 }
0x154f   :  { %v4346_v18 = vpack.c.bf16 %v4502_v6, %v4501_v16  ;;  %v2771_v33 = vpop.permute.xlu0 %2770 }
0x1550   :  { %4333 = vmatprep.subr.bf16.mxu1 %v4332_v17  ;;  %v2769_v61 = vpop.permute.xlu1 %2768 }
0x1551   :  { %4348 = vmatprep.subr.msk.bf16.mxu0 %vm4905_vm5, %v4346_v18  ;;  %4145 = vmatprep.mubr.msk.f32.mxu0 %vm388_vm4, %v2769_v61 }
0x1552   :  { %v4574_v59 = vpop.eup %4573  ;;  %4351 = vmatpush3.bf16.xpose.msk.msra.mxu0 %vm4905_vm5, %v4346_v18 }
0x1553   :  { %v4097_v19 = vpop.f32.mrb[18].mxu1  ;;  %v4576_v24 = vpop.eup %4575  ;;  %v2313_v30 = vmul.f32 %v4574_v59, %v4570_v0 }
0x1554   :  { %v2110_v21 = vpop.f32.mrb[19].mxu1  ;;  %v4128_v22 = vpop.f32.mrb[14].mxu0  ;;  %v2314_v26 = vmul.f32 %v4576_v24, %v4572_v1 }
0x1555   :  { %v2573_v27 = vadd.f32 %v4128_v22, %v4928_v32  ;;  %4100 = vmatprep.mubr.msk.f32.mxu1 %vm388_vm4, %v2110_v21  ;;  %v2567_v28 = vpop.f32.mrb[15].mxu0 }
0x1556   :  { %v2568_v31 = vadd.f32 %v2567_v28, %v4930_v34  ;;  %4101 = vmatmul.mubr.msk.f32.vlgmr.msra.gmra.mrb[20].mxu1 %vm388_vm4, %v4097_v19 }
0x1557   :  { %4335 = vmatpush3.bf16.msra.mxu1 %v4332_v17  ;;  %4114 = vmatprep.mubr.msk.f32.mxu1 %vm472_vm12, %v2313_v30  ;;  %v2579_v20 = vsel %vm472_vm12, %v2573_v27, -inf }
0x1558   :  { %2580 = vmax.xlane.f32.xlu0 %v2579_v20  ;;  %v2576_v3 = vsel %vm472_vm12, %v2568_v31, -inf  ;;  %4117 = vmatprep.subr.mxu1 %v3695_v35  ;;  %v3699_v20 = vld [vmem:[%s5436_s9 + $0x1] ss:$0 sm:$0xff] }
0x1559   :  { %4146 = vmatmul.mubr.msk.f32.vlgmr.msra.gmra.mrb[16].mxu0 %vm388_vm4, %v2771_v33  ;;  %2577 = vmax.xlane.f32.xlu1 %v2576_v3 }
0x155a   :  { %4115 = vmatmul.mubr.msk.f32.vlgmr.msra.gmra.mrb[22].mxu1 %vm472_vm12, %v2314_v26 }
0x155b   :  { %4118 = vmatpush3.msra.mxu1 %v3695_v35 }
0x15e5   :  { %v2581_v36 = vpop.xlane.xlu0 %2580 }
0x15e6   :  { %v2583_v37 = vsub.f32 %v2573_v27, %v2581_v36  ;;  %v2578_v38 = vpop.xlane.xlu1 %2577 }
0x15e7   :  { %v2582_v39 = vsub.f32 %v2568_v31, %v2578_v38 }
0x15e8   :  { %v2586_v40 = vmul.f32 1.442695, %v2583_v37 }
0x15e9   :  { %v2584_v41 = vmul.f32 1.442695, %v2582_v39 }
0x15ea   :  { %4577 = vpow2.f32 %v2586_v40 }
0x15eb   :  { %4579 = vpow2.f32 %v2584_v41 }
0x15f4   :  { %v4578_v42 = vpop.eup %4577 }
0x15f5   :  { %v4580_v43 = vpop.eup %4579  ;;  %v2591_v13 = vsel %vm472_vm12, %v4578_v42, 0.0 }
0x15f6   :  { %2592 = vadd.xlane.f32.xlu1 %v2591_v13  ;;  %v2588_v44 = vsel %vm472_vm12, %v4580_v43, 0.0 }
0x15f7   :  { %2589 = vadd.xlane.f32.xlu0 %v2588_v44 }
0x160d   :  { %4504 = vrot.lane.b32.xlu0 %v5130_v62, %s5445_s0 }
0x162c   :  { %v4147_v45 = vpop.f32.mrb[16].mxu0 }
0x162d   :  { %v4116_v46 = vpop.f32.mrb[22].mxu1  ;;  %v2850_v47 = vpop.f32.mrb[17].mxu0  ;;  %v2856_v49 = vadd.f32 %v4147_v45, %v4928_v32 }
0x162e   :  { %v2851_v48 = vadd.f32 %v2850_v47, %v4930_v34  ;;  %v2393_v11 = vpop.f32.mrb[23].mxu1 }
0x162f   :  { %4119 = vmatprep.mubr.msk.f32.mxu1 %vm388_vm4, %v2393_v11  ;;  %v2862_v51 = vsel %vm472_vm12, %v2856_v49, -inf }
0x1630   :  { %4120 = vmatmul.mubr.msk.f32.vlgmr.msra.gmra.mrb[20].mxu1 %vm388_vm4, %v4116_v46  ;;  %v2859_v50 = vsel %vm472_vm12, %v2851_v48, -inf }
0x1631   :  { %2860 = vmax.xlane.f32.xlu1 %v2859_v50  ;;  %v3739_v50 = vld [vmem:[%s5375_s15 + $0x38] sm:$0xff] }
0x1635   :  { %2863 = vmax.xlane.f32.xlu1 %v2862_v51 }
0x1683   :  { %v2593_v14 = vpop.xlane.xlu1 %2592 }
0x1684   :  { %4581 = vrcp.f32 %v2593_v14  ;;  %v2590_v52 = vpop.xlane.xlu0 %2589 }
0x1685   :  { %4583 = vrcp.f32 %v2590_v52 }
0x1688   :  { %v4505_v53 = vpop.permute.xlu0 %4504 }
0x1689   :  { %v4507_v55 = vunpack.i.h.bf16 %v4505_v53  ;;  %v4506_v34 = vunpack.i.l.bf16 %v4505_v53 }
0x168b   :  { %v4342_v57 = vpack.c.bf16 %v4507_v55, %v4506_v34 }
0x168d   :  { %4343 = vmatprep.subr.bf16.mxu1 %v4342_v57 }
0x168e   :  { %v4582_v58 = vpop.eup %4581  ;;  %4345 = vmatpush3.bf16.msra.mxu1 %v4342_v57 }
0x168f   :  { %v4584_v32 = vpop.eup %4583  ;;  %v2597_v63 = vmul.f32 %v4582_v58, %v4578_v42  ;;  %4136 = vmatprep.subr.mxu1 %v3696_v8 }
0x1690   :  { %v2596_v60 = vmul.f32 %v4584_v32, %v4580_v43  ;;  %v3734_v32 = vld [vmem:[%s5373_s13 + $0x1] ss:$0 sm:$0xff] }
0x1692   :  { %4133 = vmatprep.mubr.msk.f32.mxu1 %vm472_vm12, %v2596_v60 }
0x1693   :  { %4134 = vmatmul.mubr.msk.f32.vlgmr.msra.gmra.mrb[24].mxu1 %vm472_vm12, %v2597_v63  ;;  %v3735_v63 = vld [vmem:[%s5374_s14 + $0x1] ss:$0 sm:$0xff]  ;;  %s4615_s14 = scalar_lea.hbm %s5388_s28, 16 }
0x1694   :  { %4137 = vmatpush3.msra.mxu1 %v3696_v8  ;;  %v3747_v8 = vld [vmem:[%s5377_s17 + $0x58] sm:$0xff]  ;;  %p4616_p0 = scmp.ne.s32.totalorder %s5388_s28, %s4615_s14  ;;  %p4619_p1 = scmp.lt.u32.totalorder %s4615_s14, %s5388_s28 }
0x1696   :  { %p4621_p2 = pnand %p4619_p1, %p4616_p0 }
0x16be   :  { %v2861_v0 = vpop.xlane.xlu1 %2860 }
0x16bf   :  { %v2865_v1 = vsub.f32 %v2851_v48, %v2861_v0  ;;  %v3737_v48 = vld [vmem:[%s5375_s15 + $0x28] sm:$0xff] }
0x16c1   :  { %v2867_v5 = vmul.f32 1.442695, %v2865_v1 }
0x16c2   :  { %v2864_v2 = vpop.xlane.xlu1 %2863 }
0x16c3   :  { %v2866_v4 = vsub.f32 %v2856_v49, %v2864_v2  ;;  %v3738_v49 = vld [vmem:[%s5375_s15 + $0x30] sm:$0xff] }
0x16c4   :  { %v4360_v51 = vpack.c.bf16 %v3739_v50, %v3738_v49 }
0x16c5   :  { %v2869_v7 = vmul.f32 1.442695, %v2866_v4 }
0x16c7   :  { %4585 = vpow2.f32 %v2869_v7 }
0x16c8   :  { %4587 = vpow2.f32 %v2867_v5 }
0x16d1   :  { %v4586_v9 = vpop.eup %4585 }
0x16d2   :  { %v2874_v10 = vsel %vm472_vm12, %v4586_v9, 0.0  ;;  %v4588_v12 = vpop.eup %4587 }
0x16d3   :  { %2875 = vadd.xlane.f32.xlu1 %v2874_v10  ;;  %v2871_v15 = vsel %vm472_vm12, %v4588_v12, 0.0  ;;  %v3745_v10 = vld [vmem:[%s5377_s17 + $0x48] sm:$0xff] }
0x16d7   :  { %2872 = vadd.xlane.f32.xlu1 %v2871_v15  ;;  %v3746_v15 = vld [vmem:[%s5377_s17 + $0x50] sm:$0xff] }
0x16e8   :  { %4509 = vrot.lane.b32.xlu1 %v5130_v62, %s5446_s1  ;;  %v3697_v62 = vld [vmem:[%s5435_s30 + $0x38] sm:$0xff]  ;;  %s5447_s1 = sld [smem:[#allocation10_spill]] }
0x16ee   :  { %v3575_v23 = vld [vmem:[%s5447_s1] sm:$0x1] }
0x1760   :  { %v2876_v6 = vpop.xlane.xlu1 %2875 }
0x1761   :  { %4589 = vrcp.f32 %v2876_v6  ;;  %v4368_v6 = vpack.c.bf16 %v3747_v8, %v3746_v15 }
0x1764   :  { %v2873_v16 = vpop.xlane.xlu1 %2872 }
0x1765   :  { %4591 = vrcp.f32 %v2873_v16  ;;  %v3748_v16 = vld [vmem:[%s5377_s17 + $0x60] sm:$0xff] }
0x1766   :  { %v4135_v17 = vpop.f32.mrb[24].mxu1 }
0x1767   :  { %v2676_v18 = vpop.f32.mrb[25].mxu1 }
0x1768   :  { %4138 = vmatprep.mubr.msk.f32.mxu1 %vm388_vm4, %v2676_v18  ;;  %v4510_v61 = vpop.permute.xlu1 %4509 }
0x1769   :  { %v4512_v59 = vunpack.i.h.bf16 %v4510_v61  ;;  %v4511_v19 = vunpack.i.l.bf16 %v4510_v61  ;;  %4139 = vmatmul.mubr.msk.f32.vlgmr.msra.gmra.mrb[20].mxu1 %vm388_vm4, %v4135_v17  ;;  %v3749_v17 = vld [vmem:[%s5377_s17 + $0x68] sm:$0xff]  ;;  %v3750_v61 = vld [vmem:[%s5377_s17 + $0x70] sm:$0xff] }
0x176a   :  { %v4372_v18 = vpack.c.bf16 %v3749_v17, %v3748_v16  ;;  %v3758_v16 = vld [vmem:[%s5379_s19 + $0x1] ss:$0 sm:$0xff] }
0x176b   :  { %v4352_v21 = vpack.c.bf16 %v4512_v59, %v4511_v19  ;;  %v4590_v22 = vpop.eup %4589  ;;  %v3751_v59 = vld [vmem:[%s5377_s17 + $0x78] sm:$0xff] }
0x176c   :  { %v2880_v28 = vmul.f32 %v4590_v22, %v4586_v9  ;;  %v3744_v9 = vld [vmem:[%s5377_s17 + $0x40] sm:$0xff]  ;;  %v4376_v19 = vpack.c.bf16 %v3751_v59, %v3750_v61  ;;  %s4643_s17 = smov 1.0  }
0x176d   :  { %4353 = vmatprep.subr.bf16.mxu1 %v4352_v21 }
0x176e   :  { %4355 = vmatpush3.bf16.msra.mxu1 %v4352_v21  ;;  %v3741_v21 = vld [vmem:[%s5376_s16 + $0x1] ss:$0 sm:$0xff] }
0x176f   :  { %v4592_v24 = vpop.eup %4591  ;;  %4155 = vmatprep.subr.mxu1 %v3697_v62 }
0x1770   :  { %v2879_v27 = vmul.f32 %v4592_v24, %v4588_v12  ;;  %v4364_v12 = vpack.c.bf16 %v3745_v10, %v3744_v9 }
0x1772   :  { %4152 = vmatprep.mubr.msk.f32.mxu1 %vm472_vm12, %v2879_v27 }
0x1773   :  { %4153 = vmatmul.mubr.msk.f32.vlgmr.msra.gmra.mrb[26].mxu1 %vm472_vm12, %v2880_v28 }
0x1774   :  { %4156 = vmatpush3.msra.mxu1 %v3697_v62 }
0x1775   :  { %4365 = vmatprep.subr.bf16.mxu1 %v4364_v12 }
0x1846   :  { %v4154_v30 = vpop.f32.mrb[26].mxu1 }
0x1847   :  { %v2959_v31 = vpop.f32.mrb[27].mxu1 }
0x1848   :  { %4157 = vmatprep.mubr.msk.f32.mxu1 %vm388_vm4, %v2959_v31 }
0x1849   :  { %4158 = vmatmul.mubr.msk.f32.vlgmr.msra.gmra.mrb[20].mxu1 %vm388_vm4, %v4154_v30 }
0x184a   :  { %4367 = vmatpush3.bf16.msra.mxu1 %v4364_v12 }
0x184b   :  { %4369 = vmatprep.subr.bf16.mxu1 %v4368_v6 }
0x184e   :  { %4371 = vmatpush3.bf16.msra.mxu1 %v4368_v6 }
0x184f   :  { %4373 = vmatprep.subr.bf16.mxu1 %v4372_v18 }
0x1852   :  { %4375 = vmatpush3.bf16.msra.mxu1 %v4372_v18  ;;  %v3759_v18 = vld [vmem:[%s5380_s20 + $0x1] ss:$0 sm:$0xff] }
0x1853   :  { %4377 = vmatprep.subr.bf16.mxu1 %v4376_v19 }
0x1856   :  { %4379 = vmatpush3.bf16.msra.mxu1 %v4376_v19 }
0x191c   :  { %v4159_v26 = vpop.f32.mrb[20].mxu1 }
0x191d   :  { %v4393_v33 = vadd.f32 %v4159_v26, %v3699_v20  ;;  %v3040_v3 = vpop.f32.mrb[21].mxu1 }
0x191e   :  { %v4394_v35 = vadd.f32 %v3699_v20, %v3040_v3 }
0x191f   :  { %v3052_v36 = vadd.f32 %v4393_v33, %v5115_v56 }
0x1920   :  { %v3051_v37 = vadd.f32 %v4394_v35, %v5111_v54  ;;  %v3736_v54 = vld [vmem:[%s5375_s15 + $0x20] sm:$0xff] }
0x1921   :  { %v3060_v38 = vsel %vm207_vm3, %v3052_v36, 0.0  ;;  %v4356_v11 = vpack.c.bf16 %v3737_v48, %v3736_v54 }
0x1922   :  { %3061 = vadd.xlane.f32.xlu1 %v3060_v38  ;;  %v3057_v39 = vsel %vm207_vm3, %v3051_v37, 0.0 }
0x1923   :  { %3058 = vadd.xlane.f32.xlu0 %v3057_v39  ;;  %4357 = vmatprep.subr.bf16.mxu0 %v4356_v11 }
0x1924   :  { %4359 = vmatpush3.bf16.msra.mxu0 %v4356_v11 }
0x1925   :  { %4361 = vmatprep.subr.bf16.mxu0 %v4360_v51 }
0x1928   :  { %4363 = vmatpush3.bf16.msra.mxu0 %v4360_v51 }
0x19af   :  { %v3062_v40 = vpop.xlane.xlu1 %3061 }
0x19b0   :  { %v3064_v41 = vmul.f32 0.03125, %v3062_v40  ;;  %v3059_v42 = vpop.xlane.xlu0 %3058 }
0x19b1   :  { %v3063_v43 = vmul.f32 0.03125, %v3059_v42 }
0x19b2   :  { %v3066_v13 = vsub.f32 %v3052_v36, %v3064_v41 }
0x19b3   :  { %v3065_v44 = vsub.f32 %v3051_v37, %v3063_v43 }
0x19b4   :  { %v3068_v47 = vmul.f32 %v3066_v13, %v3066_v13 }
0x19b5   :  { %v3067_v45 = vmul.f32 %v3065_v44, %v3065_v44 }
0x19b6   :  { %v3072_v56 = vsel %vm207_vm3, %v3068_v47, 0.0 }
0x19b7   :  { %v3069_v46 = vsel %vm207_vm3, %v3067_v45, 0.0  ;;  %v3753_v45 = vld [vmem:[%s5378_s18 + $0x1] ss:$0 sm:$0xff] }
0x19b8   :  { %3070 = vadd.xlane.f32.xlu0 %v3069_v46 }
0x19bc   :  { %3073 = vadd.xlane.f32.xlu0 %v3072_v56 }
0x1a45   :  { %v3071_v14 = vpop.xlane.xlu0 %3070 }
0x1a46   :  { %v3075_v52 = vmul.f32 0.03125, %v3071_v14 }
0x1a48   :  { %v3077_v53 = vadd.f32 1e-12, %v3075_v52 }
0x1a49   :  { %v3074_v55 = vpop.xlane.xlu0 %3073 }
0x1a4a   :  { %4593 = vrsqrt.f32 %v3077_v53  ;;  %v3076_v34 = vmul.f32 0.03125, %v3074_v55 }
0x1a4c   :  { %v3078_v57 = vadd.f32 1e-12, %v3076_v34 }
0x1a4e   :  { %4595 = vrsqrt.f32 %v3078_v57 }
0x1a54   :  { %v4594_v58 = vpop.eup %4593 }
0x1a55   :  { %v3081_v60 = vmul.f32 %v4594_v58, %v3065_v44 }
0x1a57   :  { %v3089_v0 = vmul.f32 %v3734_v32, %v3081_v60 }
0x1a58   :  { %v4596_v1 = vpop.eup %4595 }
0x1a59   :  { %v3082_v2 = vmul.f32 %v4596_v1, %v3066_v13  ;;  %v3097_v4 = vadd.f32 %v3735_v63, %v3089_v0  ;;  %v3358_v0 = vld [vmem:[%s5381_s21 + $0x8] sm:$0xff] }
0x1a5b   :  { %v3090_v5 = vmul.f32 %v3734_v32, %v3082_v2  ;;  %4168 = vmatprep.mubr.msk.f32.mxu0 %vm207_vm3, %v3097_v4  ;;  %v3359_v2 = vld [vmem:[%s5381_s21 + $0x10] sm:$0xff] }
0x1a5d   :  { %v3098_v7 = vadd.f32 %v3735_v63, %v3090_v5  ;;  %v3357_v63 = vld [vmem:[%s5381_s21] sm:$0xff] }
0x1a5e   :  { %v4380_v1 = vpack.c.bf16 %v3358_v0, %v3357_v63 }
0x1a5f   :  { %4169 = vmatmul.mubr.msk.f32.vlgmr.msra.gmra.mrb[18].mxu0 %vm207_vm3, %v3098_v7 }
0x1a60   :  { %4381 = vmatprep.subr.bf16.mxu0 %v4380_v1 }
0x1a61   :  { %4383 = vmatpush3.bf16.msra.mxu0 %v4380_v1 }
0x1b32   :  { %v4170_v62 = vpop.f32.mrb[18].mxu0 }
0x1b33   :  { %v3190_v22 = vadd.f32 %v4170_v62, %v3741_v21  ;;  %v3184_v24 = vpop.f32.mrb[19].mxu0 }
0x1b34   :  { %v3185_v27 = vadd.f32 %v3741_v21, %v3184_v24  ;;  %v3760_v24 = vld [vmem:[%s5382_s22] ss:$0 sm:$0xff] }
0x1b35   :  { %v3196_v28 = vmul.f32 0.044715, %v3190_v22  ;;  %v3194_v43 = vmul.f32 0.5, %v3190_v22 }
0x1b36   :  { %v3195_v30 = vmul.f32 0.044715, %v3185_v27  ;;  %v3193_v41 = vmul.f32 0.5, %v3185_v27 }
0x1b37   :  { %v3198_v31 = vmul.f32 %v3196_v28, %v3190_v22 }
0x1b38   :  { %v3197_v20 = vmul.f32 %v3195_v30, %v3185_v27 }
0x1b39   :  { %v3200_v26 = vmul.f32 %v3198_v31, %v3190_v22 }
0x1b3a   :  { %v3199_v33 = vmul.f32 %v3197_v20, %v3185_v27 }
0x1b3b   :  { %v3202_v3 = vadd.f32 %v3200_v26, %v3190_v22 }
0x1b3c   :  { %v3201_v35 = vadd.f32 %v3199_v33, %v3185_v27 }
0x1b3d   :  { %v3204_v36 = vmul.f32 0.7978846, %v3202_v3 }
0x1b3e   :  { %v3203_v37 = vmul.f32 0.7978846, %v3201_v35 }
0x1b3f   :  { %4597 = vtanh.f32 %v3204_v36 }
0x1b40   :  { %4599 = vtanh.f32 %v3203_v37 }
0x1b49   :  { %v4598_v38 = vpop.eup %4597 }
0x1b4a   :  { %v4600_v39 = vpop.eup %4599  ;;  %v3208_v40 = vadd.f32 1.0, %v4598_v38 }
0x1b4b   :  { %v3207_v42 = vadd.f32 1.0, %v4600_v39 }
0x1b4c   :  { %v3210_v44 = vmul.f32 %v3208_v40, %v3194_v43 }
0x1b4d   :  { %v3209_v13 = vmul.f32 %v3207_v42, %v3193_v41  ;;  %v3493_v41 = vld [vmem:[#allocation2] sm:$0x1]  ;;  %v4641_v42 = vmov 0.0|0.0  }
0x1b4f   :  { %4187 = vmatprep.mubr.msk.f32.mxu1 %vm1685_vm13, %v3209_v13 }
0x1b50   :  { %4188 = vmatmul.mubr.msk.f32.vlgmr.msra.gmra.mrb[28].mxu1 %vm1685_vm13, %v3210_v44 }
0x1c23   :  { %v4189_v46 = vpop.f32.mrb[28].mxu1 }
0x1c24   :  { %v3300_v47 = vpop.f32.mrb[29].mxu1  ;;  %v3306_v56 = vadd.f32 %v4189_v46, %v3753_v45 }
0x1c25   :  { %v3301_v54 = vadd.f32 %v3753_v45, %v3300_v47 }
0x1c26   :  { %v3310_v49 = vadd.f32 %v3306_v56, %v3098_v7 }
0x1c27   :  { %v3309_v48 = vadd.f32 %v3301_v54, %v3097_v4  ;;  %v3360_v4 = vld [vmem:[%s5381_s21 + $0x18] sm:$0xff]  ;;  %v3763_v54 = vld [vmem:[%s5383_s23] ss:$0 sm:$0xff] }
0x1c28   :  { %v3318_v50 = vsel %vm207_vm3, %v3310_v49, 0.0  ;;  %v4384_v5 = vpack.c.bf16 %v3360_v4, %v3359_v2 }
0x1c29   :  { %v3315_v11 = vsel %vm207_vm3, %v3309_v48, 0.0 }
0x1c2a   :  { %3316 = vadd.xlane.f32.xlu0 %v3315_v11  ;;  %4385 = vmatprep.subr.bf16.mxu0 %v4384_v5 }
0x1c2b   :  { %4387 = vmatpush3.bf16.msra.mxu0 %v4384_v5 }
0x1c2c   :  { %4388 = vmatprep.subr.bf16.mxu0 %v4641_v42 }
0x1c2e   :  { %3319 = vadd.xlane.f32.xlu0 %v3318_v50 }
0x1cb7   :  { %v3317_v51 = vpop.xlane.xlu0 %3316 }
0x1cb8   :  { %v3321_v14 = vmul.f32 0.03125, %v3317_v51 }
0x1cba   :  { %v3323_v52 = vsub.f32 %v3309_v48, %v3321_v14 }
0x1cbb   :  { %v3320_v53 = vpop.xlane.xlu0 %3319 }
0x1cbc   :  { %v3322_v55 = vmul.f32 0.03125, %v3320_v53  ;;  %v3325_v34 = vmul.f32 %v3323_v52, %v3323_v52 }
0x1cbe   :  { %v3324_v57 = vsub.f32 %v3310_v49, %v3322_v55  ;;  %v3327_v58 = vsel %vm207_vm3, %v3325_v34, 0.0  ;;  %v3492_v55 = vld [vmem:[%s5385_s25] sm:$0x1] }
0x1cbf   :  { %3328 = vadd.xlane.f32.xlu0 %v3327_v58 }
0x1cc0   :  { %v3326_v32 = vmul.f32 %v3324_v57, %v3324_v57 }
0x1cc2   :  { %v3330_v60 = vsel %vm207_vm3, %v3326_v32, 0.0 }
0x1cc3   :  { %3331 = vadd.xlane.f32.xlu1 %v3330_v60 }
0x1d4c   :  { %v3329_v7 = vpop.xlane.xlu0 %3328 }
0x1d4d   :  { %v3333_v9 = vmul.f32 0.03125, %v3329_v7 }
0x1d4f   :  { %v3335_v10 = vadd.f32 1e-12, %v3333_v9 }
0x1d50   :  { %v3332_v12 = vpop.xlane.xlu1 %3331 }
0x1d51   :  { %4601 = vrsqrt.f32 %v3335_v10  ;;  %v3334_v15 = vmul.f32 0.03125, %v3332_v12  ;;  %v3576_v12 = vld [vmem:[%s5433_s10] sm:$0x1] }
0x1d53   :  { %v3336_v8 = vadd.f32 1e-12, %v3334_v15 }
0x1d55   :  { %4603 = vrsqrt.f32 %v3336_v8 }
0x1d5b   :  { %v4602_v6 = vpop.eup %4601 }
0x1d5c   :  { %v3339_v17 = vmul.f32 %v4602_v6, %v3323_v52 }
0x1d5e   :  { %v3347_v61 = vmul.f32 %v3758_v16, %v3339_v17 }
0x1d5f   :  { %v4604_v59 = vpop.eup %4603 }
0x1d60   :  { %v3340_v19 = vmul.f32 %v4604_v59, %v3324_v57  ;;  %v3355_v21 = vadd.f32 %v3759_v18, %v3347_v61 }
0x1d62   :  { %v3348_v62 = vmul.f32 %v3758_v16, %v3340_v19  ;;  %4198 = vmatprep.mubr.msk.f32.mxu0 %vm207_vm3, %v3355_v21  ;;  %v3599_v16 = vsel %vm3573_vm15, %v3576_v12, 0.0 }
0x1d64   :  { %v3356_v22 = vadd.f32 %v3759_v18, %v3348_v62 }
0x1d66   :  { %4199 = vmatmul.mubr.msk.f32.vlgmr.msra.gmra.mrb[20].mxu0 %vm207_vm3, %v3356_v22 }
0x1d67   :  { %4205 = vmatprep.mubr.msk.f32.mxu0 %vm4642_vm14, %v4628_v29  ;;  %v3764_v29 = vld [vmem:[%s5384_s24] ss:$0 sm:$0xff] }
0x1e39   :  { %v4200_v27 = vpop.f32.mrb[20].mxu0 }
0x1e3a   :  { %v3446_v28 = vadd.f32 %v4200_v27, %v3760_v24  ;;  %v3440_v30 = vpop.f32.mrb[21].mxu0 }
0x1e3b   :  { %v3441_v31 = vadd.f32 %v3760_v24, %v3440_v30 }
0x1e3c   :  { %v3450_v20 = vmax.f32 %v3446_v28, 0.0 }
0x1e3d   :  { %v3449_v26 = vmax.f32 %v3441_v31, 0.0 }
0x1e3e   :  { %3455 = vadd.xlane.f32.xlu1 %v3450_v20 }
0x1e3f   :  { %3453 = vadd.xlane.f32.xlu0 %v3449_v26 }
0x1ecb   :  { %v3456_v33 = vpop.xlane.xlu1 %3455 }
0x1ecc   :  { %v3459_v3 = vmul.f32 0.0078125, %v3456_v33  ;;  %v3454_v35 = vpop.xlane.xlu0 %3453 }
0x1ecd   :  { %v3458_v36 = vmul.f32 0.0078125, %v3454_v35 }
0x1ece   :  { %v3461_v37 = vsub.f32 %v3450_v20, %v3459_v3 }
0x1ecf   :  { %v3460_v38 = vsub.f32 %v3449_v26, %v3458_v36 }
0x1ed0   :  { %v3463_v39 = vmul.f32 %v3461_v37, %v3461_v37 }
0x1ed1   :  { %v3462_v40 = vmul.f32 %v3460_v38, %v3460_v38 }
0x1ed2   :  { %3466 = vadd.xlane.f32.xlu1 %v3463_v39 }
0x1ed3   :  { %3464 = vadd.xlane.f32.xlu0 %v3462_v40 }
0x1ee9   :  { %3496 = vperm.xlu0 %4431, %v3493_v41  }
0x1f5f   :  { %v3467_v43 = vpop.xlane.xlu1 %3466 }
0x1f60   :  { %v3469_v13 = vmul.f32 0.0078125, %v3467_v43  ;;  %v3465_v44 = vpop.xlane.xlu0 %3464 }
0x1f61   :  { %v3468_v45 = vmul.f32 0.0078125, %v3465_v44 }
0x1f62   :  { %v3471_v46 = vadd.f32 1e-05, %v3469_v13 }
0x1f63   :  { %v3470_v47 = vadd.f32 1e-05, %v3468_v45 }
0x1f64   :  { %4605 = vrsqrt.f32 %v3471_v46 }
0x1f65   :  { %4607 = vrsqrt.f32 %v3470_v47 }
0x1f68   :  { %v3497_v34 = vpop.permute.xlu0 %3496 }
0x1f69   :  { %v3502_v57 = vrot.slane %v3497_v34, %v271_v25 }
0x1f6e   :  { %v4606_v56 = vpop.eup %4605 }
0x1f6f   :  { %v4608_v48 = vpop.eup %4607  ;;  %v3475_v11 = vmul.f32 %v4606_v56, %v3461_v37 }
0x1f70   :  { %v3474_v49 = vmul.f32 %v4608_v48, %v3460_v38 }
0x1f71   :  { %v3483_v50 = vmul.f32 %v3763_v54, %v3475_v11 }
0x1f72   :  { %v3482_v51 = vmul.f32 %v3763_v54, %v3474_v49 }
0x1f73   :  { %v3491_v14 = vadd.f32 %v3764_v29, %v3483_v50 }
0x1f74   :  { %v3490_v52 = vadd.f32 %v3764_v29, %v3482_v51 }
0x1f76   :  { %v4389_v53 = vpack.c.bf16 %v3491_v14, %v3490_v52 }
0x1f78   :  { %4390 = vmatpush3.bf16.xpose.msra.mxu0 %v4389_v53 }
0x1f7f   :  { %4206 = vmatmul.mubr.f32.vlgmr.msra.gmra.mrb[22].mxu0 %v3492_v55 }
0x2052   :  { %v3569_v58 = vpop.f32.mrb[22].mxu0 }
0x2053   :  { %v3570_v32 = vadd.f32 %v3569_v58, %v3502_v57  ;;  %v4207_v60 = vpop.f32.mrb[23].mxu0 }
0x2055   :  { %v3580_v63 = vand.u32 2147483647, %v3570_v32  ;;  %3574 = vst.msk [vmem:[%s5387_s27] sm:$0x1] %vm3573_vm15, %v3570_v32  ;;  %v3577_v25 = vmax.f32 %v3570_v32, 0.0  ;;  %v3578_v5 = vmul.f32 %v3575_v23, %v3570_v32 }
0x2057   :  { %v3581_v0 = vsub.f32 0.0, %v3580_v63  ;;  %v3579_v9 = vsub.f32 %v3577_v25, %v3578_v5 }
0x2059   :  { %v3582_v1 = vmul.f32 1.442695, %v3581_v0 }
0x205b   :  { %4609 = vpow2.f32 %v3582_v1 }
0x2065   :  { %v4610_v2 = vpop.eup %4609 }
0x2066   :  { %v3584_v4 = vadd.f32 1.0, %v4610_v2 }
0x2068   :  { %4611 = vlog2.f32 %v3584_v4 }
0x2072   :  { %v4612_v7 = vpop.eup %4611 }
0x2073   :  { %v3586_v10 = vmul.f32 0.6931472, %v4612_v7 }
0x2075   :  { %v3587_v15 = vadd.f32 %v3586_v10, %v3579_v9 }
0x2077   :  { %v3588_v8 = vmul.f32 %v3587_v15, %v3576_v12 }
0x2079   :  { %v3589_v6 = vsel %vm3573_vm15, %v3588_v8, 0.0 }
0x207a   :  { %3590 = vadd.xlane.f32.xlu1 %v3589_v6 }
0x207e   :  { %3600 = vadd.xlane.f32.xlu1 %v3599_v16 }
0x2107   :  { %v3591_v17 = vpop.xlane.xlu1 %3590 }
0x2108   :  { %v3592_v18 = vrot.slane %v3591_v17, 4 }
0x210a   :  { %v3593_v61 = vadd.f32 %v3592_v18, %v3591_v17 }
0x210b   :  { %v3601_v59 = vpop.xlane.xlu1 %3600 }
0x210c   :  { %v3594_v19 = vrot.slane %v3593_v61, 2  ;;  %v3602_v21 = vrot.slane %v3601_v59, 4 }
0x210e   :  { %v3603_v62 = vadd.f32 %v3602_v21, %v3601_v59  ;;  %v3595_v22 = vadd.f32 %v3594_v19, %v3593_v61 }
0x2110   :  { %v3604_v24 = vrot.slane %v3603_v62, 2  ;;  %v3596_v27 = vrot.slane %v3595_v22, 1 }
0x2112   :  { %v3605_v28 = vadd.f32 %v3604_v24, %v3603_v62  ;;  %v3597_v30 = vadd.f32 %v3596_v27, %v3595_v22 }
0x2114   :  { %4407 = vpush %v3597_v30  ;;  %v3606_v31 = vrot.slane %v3605_v28, 1 }
0x2116   :  { %v3607_v20 = vadd.f32 %v3606_v31, %v3605_v28 }
0x2118   :  { %4409 = vpush %v3607_v20 }
0x2145   :  { %s4408_s27 = spop %4407 }
0x2149   :  { %s4410_s10 = spop %4409 }
0x214a   :  { %s3609_s18 = smax.f32 %s4643_s17, %s4410_s10 }
0x214b   :  { %v3610_v26 = vstv %s3609_s18 }
0x214c   :  { %4613 = vrcp.f32 %v3610_v26 }
0x2156   :  { %v4614_v33 = vpop.eup %4613 }
0x2157   :  { %4411 = vpush %v4614_v33 }
0x2188   :  { %s4412_s15 = spop %4411 }
0x2189   :  { %s3613_s3 = smul.f32 %s4412_s15, %s4408_s27 }
0x218b   :  { %3615 = sst [smem:[#allocation3]] %s3613_s3 }
0x218c   :  { %4624 = shalt.err (!%p4621_p2)
}
0x218d   :  { %s4644_s4 = smov [#allocation3]  }
0x218e   :  { %3625 = dma.smem_to_hbm %s4644_s4, 16, %s5388_s28, [#allocation4]  }
0x218f   :  { %4625 = dma.done.wait [#allocation4], 16  }
0x2190   :  { %4626 = vsyncadd [#allocation4], 4294967280 }
0x2191   :  { %3631 = sfence }
0x2192   :  { %3632 = vsyncpa [#allocation4], 1 }

</bundles_post_ra>
